<compile_context>
chip_gen: v6e
topology: v6e:2x2x1
jax: 0.10.0
libtpu: 0.0.40
codegen_flags: <defaults>
</compile_context>

<pallas_src>
import jax
import jax.numpy as jnp
from jax import lax
from jax.experimental import pallas as pl
from jax.experimental.pallas import tpu as pltpu


# --------------------------------------------------------------------------
# Pallas kernel: fused bidirectional GRU recurrence, grid = (T // TC,)
# --------------------------------------------------------------------------
def _bigru_chunk_kernel(gi_f_ref, gi_r_ref, whh_f_ref, whh_r_ref,
                        bhh_f_ref, bhh_r_ref,
                        out_f_ref, out_r_ref,
                        hf_ref, hr_ref):
    """One time-chunk of the bidirectional GRU recurrence.

    gi_f_ref : (TC, B, 3H)  precomputed x@W_ih^T + b_ih, forward dir, chunk c
    gi_r_ref : (TC, B, 3H)  same for reverse dir, chunk NC-1-c (natural order)
    whh_*_ref: (H, 3H)      W_hh^T, resident
    bhh_*_ref: (1, 3H)      b_hh, resident
    out_*_ref: (TC, B, H)   per-timestep hidden outputs for this chunk
    h*_ref   : (B, H) f32   VMEM scratch carrying the hidden state across chunks
    """
    c = pl.program_id(0)
    tc = gi_f_ref.shape[0]
    hdim = hf_ref.shape[1]

    @pl.when(c == 0)
    def _():
        hf_ref[...] = jnp.zeros_like(hf_ref)
        hr_ref[...] = jnp.zeros_like(hr_ref)

    # Hoist resident loads out of the unrolled time loop.
    w_f = whh_f_ref[...]
    w_r = whh_r_ref[...]
    b_f = bhh_f_ref[...].astype(jnp.float32)
    b_r = bhh_r_ref[...].astype(jnp.float32)

    def cell(gi, h_prev, w, b):
        # Recurrent matmul on the MXU (f32 accumulation); gate math in f32 on VPU.
        gh = jnp.dot(h_prev.astype(w.dtype), w,
                     preferred_element_type=jnp.float32) + b
        r = jax.nn.sigmoid(gi[:, :hdim] + gh[:, :hdim])
        z = jax.nn.sigmoid(gi[:, hdim:2 * hdim] + gh[:, hdim:2 * hdim])
        n = jnp.tanh(gi[:, 2 * hdim:] + r * gh[:, 2 * hdim:])
        return (1.0 - z) * n + z * h_prev

    def body(i, carry):
        # Forward direction walks the chunk 0..TC-1; reverse walks TC-1..0.
        h_f = cell(gi_f_ref[i].astype(jnp.float32), hf_ref[...], w_f, b_f)
        h_r = cell(gi_r_ref[tc - 1 - i].astype(jnp.float32), hr_ref[...], w_r, b_r)
        hf_ref[...] = h_f
        hr_ref[...] = h_r
        out_f_ref[i] = h_f.astype(out_f_ref.dtype)
        out_r_ref[tc - 1 - i] = h_r.astype(out_r_ref.dtype)
        return carry

    # Fully unrolled: gives the LLO scheduler visibility to hide the small
    # W_hh matmul latency behind the other direction's gate math.
    lax.fori_loop(0, tc, body, 0, unroll=True)


def _pick_time_chunk(T, cap):
    """Largest divisor of T that is <= cap (avoids time padding)."""
    return max(d for d in range(1, min(cap, T) + 1) if T % d == 0)


# --------------------------------------------------------------------------
# RNNLayer wrapper (GRU, bidirectional, batch_first, dropout=0.0)
# --------------------------------------------------------------------------
def rnn_layer_forward(x_btd, params, *, time_chunk=32, compute_dtype=None):
    """x_btd: (B, T, D) batch-first, like the PyTorch module. Returns (B, T, 2H)."""
    B, T, D = x_btd.shape
    H = params["w_hh_f"].shape[1]
    cdt = jnp.float32 if compute_dtype is None else compute_dtype

    # --- Hoisted input projection: one big GEMM per direction, directly
    #     emitting the time-major (T, B, 3H) layout (transpose fused into GEMM).
    gi_f = (jnp.einsum('btd,gd->tbg', x_btd, params["w_ih_f"])
            + params["b_ih_f"]).astype(cdt)
    gi_r = (jnp.einsum('btd,gd->tbg', x_btd, params["w_ih_r"])
            + params["b_ih_r"]).astype(cdt)

    whh_f = jnp.transpose(params["w_hh_f"]).astype(cdt)   # (H, 3H)
    whh_r = jnp.transpose(params["w_hh_r"]).astype(cdt)   # (H, 3H)
    bhh_f = params["b_hh_f"].reshape(1, 3 * H).astype(jnp.float32)
    bhh_r = params["b_hh_r"].reshape(1, 3 * H).astype(jnp.float32)

    tc = _pick_time_chunk(T, time_chunk)
    nc = T // tc

    grid_spec = pltpu.PrefetchScalarGridSpec(
        num_scalar_prefetch=0,
        grid=(nc,),
        in_specs=[
            # Streamed gi blocks; reverse direction reads chunks back-to-front
            # via the index_map (no jnp.flip anywhere).
            pl.BlockSpec((tc, B, 3 * H), lambda c: (c, 0, 0)),
            pl.BlockSpec((tc, B, 3 * H), lambda c: (nc - 1 - c, 0, 0)),
            # Resident weights / biases.
            pl.BlockSpec((H, 3 * H), lambda c: (0, 0)),
            pl.BlockSpec((H, 3 * H), lambda c: (0, 0)),
            pl.BlockSpec((1, 3 * H), lambda c: (0, 0)),
            pl.BlockSpec((1, 3 * H), lambda c: (0, 0)),
        ],
        out_specs=[
            pl.BlockSpec((tc, B, H), lambda c: (c, 0, 0)),
            pl.BlockSpec((tc, B, H), lambda c: (nc - 1 - c, 0, 0)),
        ],
        scratch_shapes=[pltpu.VMEM((B, H), jnp.float32),   # forward h carry
                        pltpu.VMEM((B, H), jnp.float32)],  # reverse h carry
    )

    out_f, out_r = pl.pallas_call(
        _bigru_chunk_kernel,
        out_shape=(jax.ShapeDtypeStruct((T, B, H), x_btd.dtype),
                   jax.ShapeDtypeStruct((T, B, H), x_btd.dtype)),
        grid_spec=grid_spec,
        compiler_params=pltpu.CompilerParams(
            dimension_semantics=("arbitrary",)),   # strict sequential recurrence
    )(gi_f, gi_r, whh_f, whh_r, bhh_f, bhh_r)

    out = jnp.concatenate([out_f, out_r], axis=-1)   # (T, B, 2H)
    out = jnp.transpose(out, (1, 0, 2))              # (B, T, 2H), batch_first
    # nn.Dropout(p=0.0) -> identity
    return out


# --------------------------------------------------------------------------
# Pure-JAX reference GRU (for correctness check)
# --------------------------------------------------------------------------
def gru_direction_ref(x_btd, w_ih, w_hh, b_ih, b_hh):
    B, T, D = x_btd.shape
    H = w_hh.shape[1]

    def step(h, x_t):
        gi = x_t @ w_ih.T + b_ih
        gh = h @ w_hh.T + b_hh
        i_r, i_z, i_n = gi[:, :H], gi[:, H:2 * H], gi[:, 2 * H:]
        h_r, h_z, h_n = gh[:, :H], gh[:, H:2 * H], gh[:, 2 * H:]
        r = jax.nn.sigmoid(i_r + h_r)
        z = jax.nn.sigmoid(i_z + h_z)
        n = jnp.tanh(i_n + r * h_n)
        h_new = (1.0 - z) * n + z * h
        return h_new, h_new

    h0 = jnp.zeros((B, H), jnp.float32)
    _, ys = lax.scan(step, h0, jnp.transpose(x_btd, (1, 0, 2)))
    return jnp.transpose(ys, (1, 0, 2))


def rnn_layer_ref(x_btd, params):
    fwd = gru_direction_ref(x_btd, params["w_ih_f"], params["w_hh_f"],
                            params["b_ih_f"], params["b_hh_f"])
    rev = gru_direction_ref(jnp.flip(x_btd, axis=1), params["w_ih_r"],
                            params["w_hh_r"], params["b_ih_r"], params["b_hh_r"])
    rev = jnp.flip(rev, axis=1)
    return jnp.concatenate([fwd, rev], axis=-1)


# --------------------------------------------------------------------------
# Deterministic parameter init (orthogonal weights, zero biases, like __init__)
# --------------------------------------------------------------------------
def orthogonal_init(key, shape):
    a = jax.random.normal(key, shape, dtype=jnp.float32)
    q, r = jnp.linalg.qr(a)
    q = q * jnp.sign(jnp.diag(r))[None, :]    # sign-fix for determinism
    return q[: shape[0], : shape[1]]


def make_params(key, input_dim, hidden_dim):
    ks = jax.random.split(key, 4)
    return {
        "w_ih_f": orthogonal_init(ks[0], (3 * hidden_dim, input_dim)),
        "w_hh_f": orthogonal_init(ks[1], (3 * hidden_dim, hidden_dim)),
        "b_ih_f": jnp.zeros((3 * hidden_dim,), jnp.float32),
        "b_hh_f": jnp.zeros((3 * hidden_dim,), jnp.float32),
        "w_ih_r": orthogonal_init(ks[2], (3 * hidden_dim, input_dim)),
        "w_hh_r": orthogonal_init(ks[3], (3 * hidden_dim, hidden_dim)),
        "b_ih_r": jnp.zeros((3 * hidden_dim,), jnp.float32),
        "b_hh_r": jnp.zeros((3 * hidden_dim,), jnp.float32),
    }


if __name__ == "__main__":
    B, T, D, H = 2, 8, 16, 32

    key = jax.random.PRNGKey(0)
    kx, kp = jax.random.split(key)
    x = jax.random.normal(kx, (B, T, D), dtype=jnp.float32)   # (batch, seq, input_dim)
    params = make_params(kp, D, H)

    out = jax.jit(rnn_layer_forward)(x, params)
    out = jax.block_until_ready(out)
    assert out.shape == (B, T, 2 * H), out.shape

    ref = rnn_layer_ref(x, params)
    assert jnp.allclose(out, ref, atol=1e-4, rtol=1e-4), \
        float(jnp.max(jnp.abs(out - ref)))

    print("KERNEL_OK")
</pallas_src>

<mosaic_0001>
module attributes {stable_mosaic.version = 11 : i64} {
  func.func @_bigru_chunk_kernel(%arg0: i32, %arg1: memref<8x2x96xf32, #tpu.memory_space<vmem>>, %arg2: memref<8x2x96xf32, #tpu.memory_space<vmem>>, %arg3: memref<32x96xf32, #tpu.memory_space<vmem>>, %arg4: memref<32x96xf32, #tpu.memory_space<vmem>>, %arg5: memref<1x96xf32, #tpu.memory_space<vmem>>, %arg6: memref<1x96xf32, #tpu.memory_space<vmem>>, %arg7: memref<8x2x32xf32, #tpu.memory_space<vmem>>, %arg8: memref<8x2x32xf32, #tpu.memory_space<vmem>>, %arg9: memref<2x32xf32, #tpu.memory_space<vmem>>, %arg10: memref<2x32xf32, #tpu.memory_space<vmem>>) attributes {dimension_semantics = [#tpu.dimension_semantics<arbitrary>], iteration_bounds = array<i64: 1>, scalar_prefetch = 0 : i64, scratch_operands = 2 : i64, tpu.core_type = #tpu.core_type<tc>, window_params = [{transform_indices = @transform_0, window_bounds = array<i64: 8, 2, 96>}, {transform_indices = @transform_1, window_bounds = array<i64: 8, 2, 96>}, {pipeline_mode = #tpu.pipeline_mode<synchronous>, transform_indices = @transform_2, window_bounds = array<i64: 32, 96>}, {pipeline_mode = #tpu.pipeline_mode<synchronous>, transform_indices = @transform_3, window_bounds = array<i64: 32, 96>}, {pipeline_mode = #tpu.pipeline_mode<synchronous>, transform_indices = @transform_4, window_bounds = array<i64: 1, 96>}, {pipeline_mode = #tpu.pipeline_mode<synchronous>, transform_indices = @transform_5, window_bounds = array<i64: 1, 96>}, {transform_indices = @transform_6, window_bounds = array<i64: 8, 2, 32>}, {transform_indices = @transform_7, window_bounds = array<i64: 8, 2, 32>}]} {
    %c0_i32 = arith.constant 0 : i32
    %0 = arith.cmpi eq, %arg0, %c0_i32 : i32
    %1 = arith.extui %0 : i1 to i32
    %c0_i32_0 = arith.constant 0 : i32
    %2 = arith.cmpi ne, %1, %c0_i32_0 : i32
    scf.if %2 {
      %cst_216 = arith.constant 0.000000e+00 : f32
      %631 = vector.broadcast %cst_216 : f32 to vector<2x32xf32>
      %c0_217 = arith.constant 0 : index
      %c0_218 = arith.constant 0 : index
      %632 = vector.load %arg9[%c0_217, %c0_218] : memref<2x32xf32, #tpu.memory_space<vmem>>, vector<2x32xf32>
      tpu.vector_store %arg9[%c0_217, %c0_218], %631 {strides = array<i32>} : memref<2x32xf32, #tpu.memory_space<vmem>>, vector<2x32xf32>,
      %cst_219 = arith.constant 0.000000e+00 : f32
      %633 = vector.broadcast %cst_219 : f32 to vector<2x32xf32>
      %c0_220 = arith.constant 0 : index
      %c0_221 = arith.constant 0 : index
      %634 = vector.load %arg10[%c0_220, %c0_221] : memref<2x32xf32, #tpu.memory_space<vmem>>, vector<2x32xf32>
      tpu.vector_store %arg10[%c0_220, %c0_221], %633 {strides = array<i32>} : memref<2x32xf32, #tpu.memory_space<vmem>>, vector<2x32xf32>,
    } else {
    }
    %c0 = arith.constant 0 : index
    %c0_1 = arith.constant 0 : index
    %3 = vector.load %arg3[%c0, %c0_1] : memref<32x96xf32, #tpu.memory_space<vmem>>, vector<32x96xf32>
    %c0_2 = arith.constant 0 : index
    %c0_3 = arith.constant 0 : index
    %4 = vector.load %arg4[%c0_2, %c0_3] : memref<32x96xf32, #tpu.memory_space<vmem>>, vector<32x96xf32>
    %c0_4 = arith.constant 0 : index
    %c0_5 = arith.constant 0 : index
    %5 = vector.load %arg5[%c0_4, %c0_5] : memref<1x96xf32, #tpu.memory_space<vmem>>, vector<1x96xf32>
    %c0_6 = arith.constant 0 : index
    %c0_7 = arith.constant 0 : index
    %6 = vector.load %arg6[%c0_6, %c0_7] : memref<1x96xf32, #tpu.memory_space<vmem>>, vector<1x96xf32>
    %c0_i32_8 = arith.constant 0 : i32
    %7 = arith.index_cast %c0_i32_8 : i32 to index
    %c0_9 = arith.constant 0 : index
    %c0_10 = arith.constant 0 : index
    %8 = vector.load %arg1[%7, %c0_9, %c0_10] : memref<8x2x96xf32, #tpu.memory_space<vmem>>, vector<1x2x96xf32>
    %9 = vector.shape_cast %8 : vector<1x2x96xf32> to vector<2x96xf32>
    %c0_11 = arith.constant 0 : index
    %c0_12 = arith.constant 0 : index
    %10 = vector.load %arg9[%c0_11, %c0_12] : memref<2x32xf32, #tpu.memory_space<vmem>>, vector<2x32xf32>
    %cst = arith.constant dense<0.000000e+00> : vector<2x96xf32>
    %11 = tpu.matmul %10, %3, %cst {dimension_numbers = #tpu.dot_dimension_numbers<[1], [0], [0], [1], [0, 0, 1, 1], [], []>} : vector<2x32xf32>, vector<32x96xf32>, vector<2x96xf32> -> vector<2x96xf32>
    %12 = vector.broadcast %5 : vector<1x96xf32> to vector<2x96xf32>
    %13 = arith.addf %11, %12 : vector<2x96xf32>
    %14 = vector.extract_strided_slice %9 {offsets = [0, 0], sizes = [2, 32], strides = [1, 1]} : vector<2x96xf32> to vector<2x32xf32>
    %15 = vector.extract_strided_slice %13 {offsets = [0, 0], sizes = [2, 32], strides = [1, 1]} : vector<2x96xf32> to vector<2x32xf32>
    %16 = arith.addf %14, %15 : vector<2x32xf32>
    %17 = arith.negf %16 : vector<2x32xf32>
    %18 = math.exp %17 : vector<2x32xf32>
    %cst_13 = arith.constant 1.000000e+00 : f32
    %19 = vector.broadcast %cst_13 : f32 to vector<2x32xf32>
    %20 = arith.addf %19, %18 : vector<2x32xf32>
    %21 = arith.divf %19, %20 : vector<2x32xf32>
    %22 = vector.extract_strided_slice %9 {offsets = [0, 32], sizes = [2, 32], strides = [1, 1]} : vector<2x96xf32> to vector<2x32xf32>
    %23 = vector.extract_strided_slice %13 {offsets = [0, 32], sizes = [2, 32], strides = [1, 1]} : vector<2x96xf32> to vector<2x32xf32>
    %24 = arith.addf %22, %23 : vector<2x32xf32>
    %25 = arith.negf %24 : vector<2x32xf32>
    %26 = math.exp %25 : vector<2x32xf32>
    %cst_14 = arith.constant 1.000000e+00 : f32
    %27 = vector.broadcast %cst_14 : f32 to vector<2x32xf32>
    %28 = arith.addf %27, %26 : vector<2x32xf32>
    %29 = arith.divf %27, %28 : vector<2x32xf32>
    %30 = vector.extract_strided_slice %9 {offsets = [0, 64], sizes = [2, 32], strides = [1, 1]} : vector<2x96xf32> to vector<2x32xf32>
    %31 = vector.extract_strided_slice %13 {offsets = [0, 64], sizes = [2, 32], strides = [1, 1]} : vector<2x96xf32> to vector<2x32xf32>
    %32 = arith.mulf %21, %31 : vector<2x32xf32>
    %33 = arith.addf %30, %32 : vector<2x32xf32>
    %34 = math.tanh %33 : vector<2x32xf32>
    %cst_15 = arith.constant 1.000000e+00 : f32
    %35 = vector.broadcast %cst_15 : f32 to vector<2x32xf32>
    %36 = arith.subf %35, %29 : vector<2x32xf32>
    %37 = arith.mulf %36, %34 : vector<2x32xf32>
    %38 = arith.mulf %29, %10 : vector<2x32xf32>
    %39 = arith.addf %37, %38 : vector<2x32xf32>
    %c7_i32 = arith.constant 7 : i32
    %40 = arith.subi %c7_i32, %c0_i32_8 : i32
    %41 = arith.index_cast %40 : i32 to index
    %c0_16 = arith.constant 0 : index
    %c0_17 = arith.constant 0 : index
    %42 = vector.load %arg2[%41, %c0_16, %c0_17] : memref<8x2x96xf32, #tpu.memory_space<vmem>>, vector<1x2x96xf32>
    %43 = vector.shape_cast %42 : vector<1x2x96xf32> to vector<2x96xf32>
    %c0_18 = arith.constant 0 : index
    %c0_19 = arith.constant 0 : index
    %44 = vector.load %arg10[%c0_18, %c0_19] : memref<2x32xf32, #tpu.memory_space<vmem>>, vector<2x32xf32>
    %cst_20 = arith.constant dense<0.000000e+00> : vector<2x96xf32>
    %45 = tpu.matmul %44, %4, %cst_20 {dimension_numbers = #tpu.dot_dimension_numbers<[1], [0], [0], [1], [0, 0, 1, 1], [], []>} : vector<2x32xf32>, vector<32x96xf32>, vector<2x96xf32> -> vector<2x96xf32>
    %46 = vector.broadcast %6 : vector<1x96xf32> to vector<2x96xf32>
    %47 = arith.addf %45, %46 : vector<2x96xf32>
    %48 = vector.extract_strided_slice %43 {offsets = [0, 0], sizes = [2, 32], strides = [1, 1]} : vector<2x96xf32> to vector<2x32xf32>
    %49 = vector.extract_strided_slice %47 {offsets = [0, 0], sizes = [2, 32], strides = [1, 1]} : vector<2x96xf32> to vector<2x32xf32>
    %50 = arith.addf %48, %49 : vector<2x32xf32>
    %51 = arith.negf %50 : vector<2x32xf32>
    %52 = math.exp %51 : vector<2x32xf32>
    %cst_21 = arith.constant 1.000000e+00 : f32
    %53 = vector.broadcast %cst_21 : f32 to vector<2x32xf32>
    %54 = arith.addf %53, %52 : vector<2x32xf32>
    %55 = arith.divf %53, %54 : vector<2x32xf32>
    %56 = vector.extract_strided_slice %43 {offsets = [0, 32], sizes = [2, 32], strides = [1, 1]} : vector<2x96xf32> to vector<2x32xf32>
    %57 = vector.extract_strided_slice %47 {offsets = [0, 32], sizes = [2, 32], strides = [1, 1]} : vector<2x96xf32> to vector<2x32xf32>
    %58 = arith.addf %56, %57 : vector<2x32xf32>
    %59 = arith.negf %58 : vector<2x32xf32>
    %60 = math.exp %59 : vector<2x32xf32>
    %cst_22 = arith.constant 1.000000e+00 : f32
    %61 = vector.broadcast %cst_22 : f32 to vector<2x32xf32>
    %62 = arith.addf %61, %60 : vector<2x32xf32>
    %63 = arith.divf %61, %62 : vector<2x32xf32>
    %64 = vector.extract_strided_slice %43 {offsets = [0, 64], sizes = [2, 32], strides = [1, 1]} : vector<2x96xf32> to vector<2x32xf32>
    %65 = vector.extract_strided_slice %47 {offsets = [0, 64], sizes = [2, 32], strides = [1, 1]} : vector<2x96xf32> to vector<2x32xf32>
    %66 = arith.mulf %55, %65 : vector<2x32xf32>
    %67 = arith.addf %64, %66 : vector<2x32xf32>
    %68 = math.tanh %67 : vector<2x32xf32>
    %cst_23 = arith.constant 1.000000e+00 : f32
    %69 = vector.broadcast %cst_23 : f32 to vector<2x32xf32>
    %70 = arith.subf %69, %63 : vector<2x32xf32>
    %71 = arith.mulf %70, %68 : vector<2x32xf32>
    %72 = arith.mulf %63, %44 : vector<2x32xf32>
    %73 = arith.addf %71, %72 : vector<2x32xf32>
    %c0_24 = arith.constant 0 : index
    %c0_25 = arith.constant 0 : index
    %74 = vector.load %arg9[%c0_24, %c0_25] : memref<2x32xf32, #tpu.memory_space<vmem>>, vector<2x32xf32>
    tpu.vector_store %arg9[%c0_24, %c0_25], %39 {strides = array<i32>} : memref<2x32xf32, #tpu.memory_space<vmem>>, vector<2x32xf32>,
    %c0_26 = arith.constant 0 : index
    %c0_27 = arith.constant 0 : index
    %75 = vector.load %arg10[%c0_26, %c0_27] : memref<2x32xf32, #tpu.memory_space<vmem>>, vector<2x32xf32>
    tpu.vector_store %arg10[%c0_26, %c0_27], %73 {strides = array<i32>} : memref<2x32xf32, #tpu.memory_space<vmem>>, vector<2x32xf32>,
    %76 = arith.index_cast %c0_i32_8 : i32 to index
    %c0_28 = arith.constant 0 : index
    %c0_29 = arith.constant 0 : index
    %77 = vector.load %arg7[%76, %c0_28, %c0_29] : memref<8x2x32xf32, #tpu.memory_space<vmem>>, vector<1x2x32xf32>
    %78 = vector.shape_cast %77 : vector<1x2x32xf32> to vector<2x32xf32>
    %79 = vector.shape_cast %39 : vector<2x32xf32> to vector<1x2x32xf32>
    tpu.vector_store %arg7[%76, %c0_28, %c0_29], %79 {strides = array<i32>} : memref<8x2x32xf32, #tpu.memory_space<vmem>>, vector<1x2x32xf32>,
    %c7_i32_30 = arith.constant 7 : i32
    %80 = arith.subi %c7_i32_30, %c0_i32_8 : i32
    %81 = arith.index_cast %80 : i32 to index
    %c0_31 = arith.constant 0 : index
    %c0_32 = arith.constant 0 : index
    %82 = vector.load %arg8[%81, %c0_31, %c0_32] : memref<8x2x32xf32, #tpu.memory_space<vmem>>, vector<1x2x32xf32>
    %83 = vector.shape_cast %82 : vector<1x2x32xf32> to vector<2x32xf32>
    %84 = vector.shape_cast %73 : vector<2x32xf32> to vector<1x2x32xf32>
    tpu.vector_store %arg8[%81, %c0_31, %c0_32], %84 {strides = array<i32>} : memref<8x2x32xf32, #tpu.memory_space<vmem>>, vector<1x2x32xf32>,
    %c1_i32 = arith.constant 1 : i32
    %85 = arith.index_cast %c1_i32 : i32 to index
    %c0_33 = arith.constant 0 : index
    %c0_34 = arith.constant 0 : index
    %86 = vector.load %arg1[%85, %c0_33, %c0_34] : memref<8x2x96xf32, #tpu.memory_space<vmem>>, vector<1x2x96xf32>
    %87 = vector.shape_cast %86 : vector<1x2x96xf32> to vector<2x96xf32>
    %c0_35 = arith.constant 0 : index
    %c0_36 = arith.constant 0 : index
    %88 = vector.load %arg9[%c0_35, %c0_36] : memref<2x32xf32, #tpu.memory_space<vmem>>, vector<2x32xf32>
    %cst_37 = arith.constant dense<0.000000e+00> : vector<2x96xf32>
    %89 = tpu.matmul %88, %3, %cst_37 {dimension_numbers = #tpu.dot_dimension_numbers<[1], [0], [0], [1], [0, 0, 1, 1], [], []>} : vector<2x32xf32>, vector<32x96xf32>, vector<2x96xf32> -> vector<2x96xf32>
    %90 = vector.broadcast %5 : vector<1x96xf32> to vector<2x96xf32>
    %91 = arith.addf %89, %90 : vector<2x96xf32>
    %92 = vector.extract_strided_slice %87 {offsets = [0, 0], sizes = [2, 32], strides = [1, 1]} : vector<2x96xf32> to vector<2x32xf32>
    %93 = vector.extract_strided_slice %91 {offsets = [0, 0], sizes = [2, 32], strides = [1, 1]} : vector<2x96xf32> to vector<2x32xf32>
    %94 = arith.addf %92, %93 : vector<2x32xf32>
    %95 = arith.negf %94 : vector<2x32xf32>
    %96 = math.exp %95 : vector<2x32xf32>
    %cst_38 = arith.constant 1.000000e+00 : f32
    %97 = vector.broadcast %cst_38 : f32 to vector<2x32xf32>
    %98 = arith.addf %97, %96 : vector<2x32xf32>
    %99 = arith.divf %97, %98 : vector<2x32xf32>
    %100 = vector.extract_strided_slice %87 {offsets = [0, 32], sizes = [2, 32], strides = [1, 1]} : vector<2x96xf32> to vector<2x32xf32>
    %101 = vector.extract_strided_slice %91 {offsets = [0, 32], sizes = [2, 32], strides = [1, 1]} : vector<2x96xf32> to vector<2x32xf32>
    %102 = arith.addf %100, %101 : vector<2x32xf32>
    %103 = arith.negf %102 : vector<2x32xf32>
    %104 = math.exp %103 : vector<2x32xf32>
    %cst_39 = arith.constant 1.000000e+00 : f32
    %105 = vector.broadcast %cst_39 : f32 to vector<2x32xf32>
    %106 = arith.addf %105, %104 : vector<2x32xf32>
    %107 = arith.divf %105, %106 : vector<2x32xf32>
    %108 = vector.extract_strided_slice %87 {offsets = [0, 64], sizes = [2, 32], strides = [1, 1]} : vector<2x96xf32> to vector<2x32xf32>
    %109 = vector.extract_strided_slice %91 {offsets = [0, 64], sizes = [2, 32], strides = [1, 1]} : vector<2x96xf32> to vector<2x32xf32>
    %110 = arith.mulf %99, %109 : vector<2x32xf32>
    %111 = arith.addf %108, %110 : vector<2x32xf32>
    %112 = math.tanh %111 : vector<2x32xf32>
    %cst_40 = arith.constant 1.000000e+00 : f32
    %113 = vector.broadcast %cst_40 : f32 to vector<2x32xf32>
    %114 = arith.subf %113, %107 : vector<2x32xf32>
    %115 = arith.mulf %114, %112 : vector<2x32xf32>
    %116 = arith.mulf %107, %88 : vector<2x32xf32>
    %117 = arith.addf %115, %116 : vector<2x32xf32>
    %c7_i32_41 = arith.constant 7 : i32
    %118 = arith.subi %c7_i32_41, %c1_i32 : i32
    %119 = arith.index_cast %118 : i32 to index
    %c0_42 = arith.constant 0 : index
    %c0_43 = arith.constant 0 : index
    %120 = vector.load %arg2[%119, %c0_42, %c0_43] : memref<8x2x96xf32, #tpu.memory_space<vmem>>, vector<1x2x96xf32>
    %121 = vector.shape_cast %120 : vector<1x2x96xf32> to vector<2x96xf32>
    %c0_44 = arith.constant 0 : index
    %c0_45 = arith.constant 0 : index
    %122 = vector.load %arg10[%c0_44, %c0_45] : memref<2x32xf32, #tpu.memory_space<vmem>>, vector<2x32xf32>
    %cst_46 = arith.constant dense<0.000000e+00> : vector<2x96xf32>
    %123 = tpu.matmul %122, %4, %cst_46 {dimension_numbers = #tpu.dot_dimension_numbers<[1], [0], [0], [1], [0, 0, 1, 1], [], []>} : vector<2x32xf32>, vector<32x96xf32>, vector<2x96xf32> -> vector<2x96xf32>
    %124 = vector.broadcast %6 : vector<1x96xf32> to vector<2x96xf32>
    %125 = arith.addf %123, %124 : vector<2x96xf32>
    %126 = vector.extract_strided_slice %121 {offsets = [0, 0], sizes = [2, 32], strides = [1, 1]} : vector<2x96xf32> to vector<2x32xf32>
    %127 = vector.extract_strided_slice %125 {offsets = [0, 0], sizes = [2, 32], strides = [1, 1]} : vector<2x96xf32> to vector<2x32xf32>
    %128 = arith.addf %126, %127 : vector<2x32xf32>
    %129 = arith.negf %128 : vector<2x32xf32>
    %130 = math.exp %129 : vector<2x32xf32>
    %cst_47 = arith.constant 1.000000e+00 : f32
    %131 = vector.broadcast %cst_47 : f32 to vector<2x32xf32>
    %132 = arith.addf %131, %130 : vector<2x32xf32>
    %133 = arith.divf %131, %132 : vector<2x32xf32>
    %134 = vector.extract_strided_slice %121 {offsets = [0, 32], sizes = [2, 32], strides = [1, 1]} : vector<2x96xf32> to vector<2x32xf32>
    %135 = vector.extract_strided_slice %125 {offsets = [0, 32], sizes = [2, 32], strides = [1, 1]} : vector<2x96xf32> to vector<2x32xf32>
    %136 = arith.addf %134, %135 : vector<2x32xf32>
    %137 = arith.negf %136 : vector<2x32xf32>
    %138 = math.exp %137 : vector<2x32xf32>
    %cst_48 = arith.constant 1.000000e+00 : f32
    %139 = vector.broadcast %cst_48 : f32 to vector<2x32xf32>
    %140 = arith.addf %139, %138 : vector<2x32xf32>
    %141 = arith.divf %139, %140 : vector<2x32xf32>
    %142 = vector.extract_strided_slice %121 {offsets = [0, 64], sizes = [2, 32], strides = [1, 1]} : vector<2x96xf32> to vector<2x32xf32>
    %143 = vector.extract_strided_slice %125 {offsets = [0, 64], sizes = [2, 32], strides = [1, 1]} : vector<2x96xf32> to vector<2x32xf32>
    %144 = arith.mulf %133, %143 : vector<2x32xf32>
    %145 = arith.addf %142, %144 : vector<2x32xf32>
    %146 = math.tanh %145 : vector<2x32xf32>
    %cst_49 = arith.constant 1.000000e+00 : f32
    %147 = vector.broadcast %cst_49 : f32 to vector<2x32xf32>
    %148 = arith.subf %147, %141 : vector<2x32xf32>
    %149 = arith.mulf %148, %146 : vector<2x32xf32>
    %150 = arith.mulf %141, %122 : vector<2x32xf32>
    %151 = arith.addf %149, %150 : vector<2x32xf32>
    %c0_50 = arith.constant 0 : index
    %c0_51 = arith.constant 0 : index
    %152 = vector.load %arg9[%c0_50, %c0_51] : memref<2x32xf32, #tpu.memory_space<vmem>>, vector<2x32xf32>
    tpu.vector_store %arg9[%c0_50, %c0_51], %117 {strides = array<i32>} : memref<2x32xf32, #tpu.memory_space<vmem>>, vector<2x32xf32>,
    %c0_52 = arith.constant 0 : index
    %c0_53 = arith.constant 0 : index
    %153 = vector.load %arg10[%c0_52, %c0_53] : memref<2x32xf32, #tpu.memory_space<vmem>>, vector<2x32xf32>
    tpu.vector_store %arg10[%c0_52, %c0_53], %151 {strides = array<i32>} : memref<2x32xf32, #tpu.memory_space<vmem>>, vector<2x32xf32>,
    %154 = arith.index_cast %c1_i32 : i32 to index
    %c0_54 = arith.constant 0 : index
    %c0_55 = arith.constant 0 : index
    %155 = vector.load %arg7[%154, %c0_54, %c0_55] : memref<8x2x32xf32, #tpu.memory_space<vmem>>, vector<1x2x32xf32>
    %156 = vector.shape_cast %155 : vector<1x2x32xf32> to vector<2x32xf32>
    %157 = vector.shape_cast %117 : vector<2x32xf32> to vector<1x2x32xf32>
    tpu.vector_store %arg7[%154, %c0_54, %c0_55], %157 {strides = array<i32>} : memref<8x2x32xf32, #tpu.memory_space<vmem>>, vector<1x2x32xf32>,
    %c7_i32_56 = arith.constant 7 : i32
    %158 = arith.subi %c7_i32_56, %c1_i32 : i32
    %159 = arith.index_cast %158 : i32 to index
    %c0_57 = arith.constant 0 : index
    %c0_58 = arith.constant 0 : index
    %160 = vector.load %arg8[%159, %c0_57, %c0_58] : memref<8x2x32xf32, #tpu.memory_space<vmem>>, vector<1x2x32xf32>
    %161 = vector.shape_cast %160 : vector<1x2x32xf32> to vector<2x32xf32>
    %162 = vector.shape_cast %151 : vector<2x32xf32> to vector<1x2x32xf32>
    tpu.vector_store %arg8[%159, %c0_57, %c0_58], %162 {strides = array<i32>} : memref<8x2x32xf32, #tpu.memory_space<vmem>>, vector<1x2x32xf32>,
    %c2_i32 = arith.constant 2 : i32
    %163 = arith.index_cast %c2_i32 : i32 to index
    %c0_59 = arith.constant 0 : index
    %c0_60 = arith.constant 0 : index
    %164 = vector.load %arg1[%163, %c0_59, %c0_60] : memref<8x2x96xf32, #tpu.memory_space<vmem>>, vector<1x2x96xf32>
    %165 = vector.shape_cast %164 : vector<1x2x96xf32> to vector<2x96xf32>
    %c0_61 = arith.constant 0 : index
    %c0_62 = arith.constant 0 : index
    %166 = vector.load %arg9[%c0_61, %c0_62] : memref<2x32xf32, #tpu.memory_space<vmem>>, vector<2x32xf32>
    %cst_63 = arith.constant dense<0.000000e+00> : vector<2x96xf32>
    %167 = tpu.matmul %166, %3, %cst_63 {dimension_numbers = #tpu.dot_dimension_numbers<[1], [0], [0], [1], [0, 0, 1, 1], [], []>} : vector<2x32xf32>, vector<32x96xf32>, vector<2x96xf32> -> vector<2x96xf32>
    %168 = vector.broadcast %5 : vector<1x96xf32> to vector<2x96xf32>
    %169 = arith.addf %167, %168 : vector<2x96xf32>
    %170 = vector.extract_strided_slice %165 {offsets = [0, 0], sizes = [2, 32], strides = [1, 1]} : vector<2x96xf32> to vector<2x32xf32>
    %171 = vector.extract_strided_slice %169 {offsets = [0, 0], sizes = [2, 32], strides = [1, 1]} : vector<2x96xf32> to vector<2x32xf32>
    %172 = arith.addf %170, %171 : vector<2x32xf32>
    %173 = arith.negf %172 : vector<2x32xf32>
    %174 = math.exp %173 : vector<2x32xf32>
    %cst_64 = arith.constant 1.000000e+00 : f32
    %175 = vector.broadcast %cst_64 : f32 to vector<2x32xf32>
    %176 = arith.addf %175, %174 : vector<2x32xf32>
    %177 = arith.divf %175, %176 : vector<2x32xf32>
    %178 = vector.extract_strided_slice %165 {offsets = [0, 32], sizes = [2, 32], strides = [1, 1]} : vector<2x96xf32> to vector<2x32xf32>
    %179 = vector.extract_strided_slice %169 {offsets = [0, 32], sizes = [2, 32], strides = [1, 1]} : vector<2x96xf32> to vector<2x32xf32>
    %180 = arith.addf %178, %179 : vector<2x32xf32>
    %181 = arith.negf %180 : vector<2x32xf32>
    %182 = math.exp %181 : vector<2x32xf32>
    %cst_65 = arith.constant 1.000000e+00 : f32
    %183 = vector.broadcast %cst_65 : f32 to vector<2x32xf32>
    %184 = arith.addf %183, %182 : vector<2x32xf32>
    %185 = arith.divf %183, %184 : vector<2x32xf32>
    %186 = vector.extract_strided_slice %165 {offsets = [0, 64], sizes = [2, 32], strides = [1, 1]} : vector<2x96xf32> to vector<2x32xf32>
    %187 = vector.extract_strided_slice %169 {offsets = [0, 64], sizes = [2, 32], strides = [1, 1]} : vector<2x96xf32> to vector<2x32xf32>
    %188 = arith.mulf %177, %187 : vector<2x32xf32>
    %189 = arith.addf %186, %188 : vector<2x32xf32>
    %190 = math.tanh %189 : vector<2x32xf32>
    %cst_66 = arith.constant 1.000000e+00 : f32
    %191 = vector.broadcast %cst_66 : f32 to vector<2x32xf32>
    %192 = arith.subf %191, %185 : vector<2x32xf32>
    %193 = arith.mulf %192, %190 : vector<2x32xf32>
    %194 = arith.mulf %185, %166 : vector<2x32xf32>
    %195 = arith.addf %193, %194 : vector<2x32xf32>
    %c7_i32_67 = arith.constant 7 : i32
    %196 = arith.subi %c7_i32_67, %c2_i32 : i32
    %197 = arith.index_cast %196 : i32 to index
    %c0_68 = arith.constant 0 : index
    %c0_69 = arith.constant 0 : index
    %198 = vector.load %arg2[%197, %c0_68, %c0_69] : memref<8x2x96xf32, #tpu.memory_space<vmem>>, vector<1x2x96xf32>
    %199 = vector.shape_cast %198 : vector<1x2x96xf32> to vector<2x96xf32>
    %c0_70 = arith.constant 0 : index
    %c0_71 = arith.constant 0 : index
    %200 = vector.load %arg10[%c0_70, %c0_71] : memref<2x32xf32, #tpu.memory_space<vmem>>, vector<2x32xf32>
    %cst_72 = arith.constant dense<0.000000e+00> : vector<2x96xf32>
    %201 = tpu.matmul %200, %4, %cst_72 {dimension_numbers = #tpu.dot_dimension_numbers<[1], [0], [0], [1], [0, 0, 1, 1], [], []>} : vector<2x32xf32>, vector<32x96xf32>, vector<2x96xf32> -> vector<2x96xf32>
    %202 = vector.broadcast %6 : vector<1x96xf32> to vector<2x96xf32>
    %203 = arith.addf %201, %202 : vector<2x96xf32>
    %204 = vector.extract_strided_slice %199 {offsets = [0, 0], sizes = [2, 32], strides = [1, 1]} : vector<2x96xf32> to vector<2x32xf32>
    %205 = vector.extract_strided_slice %203 {offsets = [0, 0], sizes = [2, 32], strides = [1, 1]} : vector<2x96xf32> to vector<2x32xf32>
    %206 = arith.addf %204, %205 : vector<2x32xf32>
    %207 = arith.negf %206 : vector<2x32xf32>
    %208 = math.exp %207 : vector<2x32xf32>
    %cst_73 = arith.constant 1.000000e+00 : f32
    %209 = vector.broadcast %cst_73 : f32 to vector<2x32xf32>
    %210 = arith.addf %209, %208 : vector<2x32xf32>
    %211 = arith.divf %209, %210 : vector<2x32xf32>
    %212 = vector.extract_strided_slice %199 {offsets = [0, 32], sizes = [2, 32], strides = [1, 1]} : vector<2x96xf32> to vector<2x32xf32>
    %213 = vector.extract_strided_slice %203 {offsets = [0, 32], sizes = [2, 32], strides = [1, 1]} : vector<2x96xf32> to vector<2x32xf32>
    %214 = arith.addf %212, %213 : vector<2x32xf32>
    %215 = arith.negf %214 : vector<2x32xf32>
    %216 = math.exp %215 : vector<2x32xf32>
    %cst_74 = arith.constant 1.000000e+00 : f32
    %217 = vector.broadcast %cst_74 : f32 to vector<2x32xf32>
    %218 = arith.addf %217, %216 : vector<2x32xf32>
    %219 = arith.divf %217, %218 : vector<2x32xf32>
    %220 = vector.extract_strided_slice %199 {offsets = [0, 64], sizes = [2, 32], strides = [1, 1]} : vector<2x96xf32> to vector<2x32xf32>
    %221 = vector.extract_strided_slice %203 {offsets = [0, 64], sizes = [2, 32], strides = [1, 1]} : vector<2x96xf32> to vector<2x32xf32>
    %222 = arith.mulf %211, %221 : vector<2x32xf32>
    %223 = arith.addf %220, %222 : vector<2x32xf32>
    %224 = math.tanh %223 : vector<2x32xf32>
    %cst_75 = arith.constant 1.000000e+00 : f32
    %225 = vector.broadcast %cst_75 : f32 to vector<2x32xf32>
    %226 = arith.subf %225, %219 : vector<2x32xf32>
    %227 = arith.mulf %226, %224 : vector<2x32xf32>
    %228 = arith.mulf %219, %200 : vector<2x32xf32>
    %229 = arith.addf %227, %228 : vector<2x32xf32>
    %c0_76 = arith.constant 0 : index
    %c0_77 = arith.constant 0 : index
    %230 = vector.load %arg9[%c0_76, %c0_77] : memref<2x32xf32, #tpu.memory_space<vmem>>, vector<2x32xf32>
    tpu.vector_store %arg9[%c0_76, %c0_77], %195 {strides = array<i32>} : memref<2x32xf32, #tpu.memory_space<vmem>>, vector<2x32xf32>,
    %c0_78 = arith.constant 0 : index
    %c0_79 = arith.constant 0 : index
    %231 = vector.load %arg10[%c0_78, %c0_79] : memref<2x32xf32, #tpu.memory_space<vmem>>, vector<2x32xf32>
    tpu.vector_store %arg10[%c0_78, %c0_79], %229 {strides = array<i32>} : memref<2x32xf32, #tpu.memory_space<vmem>>, vector<2x32xf32>,
    %232 = arith.index_cast %c2_i32 : i32 to index
    %c0_80 = arith.constant 0 : index
    %c0_81 = arith.constant 0 : index
    %233 = vector.load %arg7[%232, %c0_80, %c0_81] : memref<8x2x32xf32, #tpu.memory_space<vmem>>, vector<1x2x32xf32>
    %234 = vector.shape_cast %233 : vector<1x2x32xf32> to vector<2x32xf32>
    %235 = vector.shape_cast %195 : vector<2x32xf32> to vector<1x2x32xf32>
    tpu.vector_store %arg7[%232, %c0_80, %c0_81], %235 {strides = array<i32>} : memref<8x2x32xf32, #tpu.memory_space<vmem>>, vector<1x2x32xf32>,
    %c7_i32_82 = arith.constant 7 : i32
    %236 = arith.subi %c7_i32_82, %c2_i32 : i32
    %237 = arith.index_cast %236 : i32 to index
    %c0_83 = arith.constant 0 : index
    %c0_84 = arith.constant 0 : index
    %238 = vector.load %arg8[%237, %c0_83, %c0_84] : memref<8x2x32xf32, #tpu.memory_space<vmem>>, vector<1x2x32xf32>
    %239 = vector.shape_cast %238 : vector<1x2x32xf32> to vector<2x32xf32>
    %240 = vector.shape_cast %229 : vector<2x32xf32> to vector<1x2x32xf32>
    tpu.vector_store %arg8[%237, %c0_83, %c0_84], %240 {strides = array<i32>} : memref<8x2x32xf32, #tpu.memory_space<vmem>>, vector<1x2x32xf32>,
    %c3_i32 = arith.constant 3 : i32
    %241 = arith.index_cast %c3_i32 : i32 to index
    %c0_85 = arith.constant 0 : index
    %c0_86 = arith.constant 0 : index
    %242 = vector.load %arg1[%241, %c0_85, %c0_86] : memref<8x2x96xf32, #tpu.memory_space<vmem>>, vector<1x2x96xf32>
    %243 = vector.shape_cast %242 : vector<1x2x96xf32> to vector<2x96xf32>
    %c0_87 = arith.constant 0 : index
    %c0_88 = arith.constant 0 : index
    %244 = vector.load %arg9[%c0_87, %c0_88] : memref<2x32xf32, #tpu.memory_space<vmem>>, vector<2x32xf32>
    %cst_89 = arith.constant dense<0.000000e+00> : vector<2x96xf32>
    %245 = tpu.matmul %244, %3, %cst_89 {dimension_numbers = #tpu.dot_dimension_numbers<[1], [0], [0], [1], [0, 0, 1, 1], [], []>} : vector<2x32xf32>, vector<32x96xf32>, vector<2x96xf32> -> vector<2x96xf32>
    %246 = vector.broadcast %5 : vector<1x96xf32> to vector<2x96xf32>
    %247 = arith.addf %245, %246 : vector<2x96xf32>
    %248 = vector.extract_strided_slice %243 {offsets = [0, 0], sizes = [2, 32], strides = [1, 1]} : vector<2x96xf32> to vector<2x32xf32>
    %249 = vector.extract_strided_slice %247 {offsets = [0, 0], sizes = [2, 32], strides = [1, 1]} : vector<2x96xf32> to vector<2x32xf32>
    %250 = arith.addf %248, %249 : vector<2x32xf32>
    %251 = arith.negf %250 : vector<2x32xf32>
    %252 = math.exp %251 : vector<2x32xf32>
    %cst_90 = arith.constant 1.000000e+00 : f32
    %253 = vector.broadcast %cst_90 : f32 to vector<2x32xf32>
    %254 = arith.addf %253, %252 : vector<2x32xf32>
    %255 = arith.divf %253, %254 : vector<2x32xf32>
    %256 = vector.extract_strided_slice %243 {offsets = [0, 32], sizes = [2, 32], strides = [1, 1]} : vector<2x96xf32> to vector<2x32xf32>
    %257 = vector.extract_strided_slice %247 {offsets = [0, 32], sizes = [2, 32], strides = [1, 1]} : vector<2x96xf32> to vector<2x32xf32>
    %258 = arith.addf %256, %257 : vector<2x32xf32>
    %259 = arith.negf %258 : vector<2x32xf32>
    %260 = math.exp %259 : vector<2x32xf32>
    %cst_91 = arith.constant 1.000000e+00 : f32
    %261 = vector.broadcast %cst_91 : f32 to vector<2x32xf32>
    %262 = arith.addf %261, %260 : vector<2x32xf32>
    %263 = arith.divf %261, %262 : vector<2x32xf32>
    %264 = vector.extract_strided_slice %243 {offsets = [0, 64], sizes = [2, 32], strides = [1, 1]} : vector<2x96xf32> to vector<2x32xf32>
    %265 = vector.extract_strided_slice %247 {offsets = [0, 64], sizes = [2, 32], strides = [1, 1]} : vector<2x96xf32> to vector<2x32xf32>
    %266 = arith.mulf %255, %265 : vector<2x32xf32>
    %267 = arith.addf %264, %266 : vector<2x32xf32>
    %268 = math.tanh %267 : vector<2x32xf32>
    %cst_92 = arith.constant 1.000000e+00 : f32
    %269 = vector.broadcast %cst_92 : f32 to vector<2x32xf32>
    %270 = arith.subf %269, %263 : vector<2x32xf32>
    %271 = arith.mulf %270, %268 : vector<2x32xf32>
    %272 = arith.mulf %263, %244 : vector<2x32xf32>
    %273 = arith.addf %271, %272 : vector<2x32xf32>
    %c7_i32_93 = arith.constant 7 : i32
    %274 = arith.subi %c7_i32_93, %c3_i32 : i32
    %275 = arith.index_cast %274 : i32 to index
    %c0_94 = arith.constant 0 : index
    %c0_95 = arith.constant 0 : index
    %276 = vector.load %arg2[%275, %c0_94, %c0_95] : memref<8x2x96xf32, #tpu.memory_space<vmem>>, vector<1x2x96xf32>
    %277 = vector.shape_cast %276 : vector<1x2x96xf32> to vector<2x96xf32>
    %c0_96 = arith.constant 0 : index
    %c0_97 = arith.constant 0 : index
    %278 = vector.load %arg10[%c0_96, %c0_97] : memref<2x32xf32, #tpu.memory_space<vmem>>, vector<2x32xf32>
    %cst_98 = arith.constant dense<0.000000e+00> : vector<2x96xf32>
    %279 = tpu.matmul %278, %4, %cst_98 {dimension_numbers = #tpu.dot_dimension_numbers<[1], [0], [0], [1], [0, 0, 1, 1], [], []>} : vector<2x32xf32>, vector<32x96xf32>, vector<2x96xf32> -> vector<2x96xf32>
    %280 = vector.broadcast %6 : vector<1x96xf32> to vector<2x96xf32>
    %281 = arith.addf %279, %280 : vector<2x96xf32>
    %282 = vector.extract_strided_slice %277 {offsets = [0, 0], sizes = [2, 32], strides = [1, 1]} : vector<2x96xf32> to vector<2x32xf32>
    %283 = vector.extract_strided_slice %281 {offsets = [0, 0], sizes = [2, 32], strides = [1, 1]} : vector<2x96xf32> to vector<2x32xf32>
    %284 = arith.addf %282, %283 : vector<2x32xf32>
    %285 = arith.negf %284 : vector<2x32xf32>
    %286 = math.exp %285 : vector<2x32xf32>
    %cst_99 = arith.constant 1.000000e+00 : f32
    %287 = vector.broadcast %cst_99 : f32 to vector<2x32xf32>
    %288 = arith.addf %287, %286 : vector<2x32xf32>
    %289 = arith.divf %287, %288 : vector<2x32xf32>
    %290 = vector.extract_strided_slice %277 {offsets = [0, 32], sizes = [2, 32], strides = [1, 1]} : vector<2x96xf32> to vector<2x32xf32>
    %291 = vector.extract_strided_slice %281 {offsets = [0, 32], sizes = [2, 32], strides = [1, 1]} : vector<2x96xf32> to vector<2x32xf32>
    %292 = arith.addf %290, %291 : vector<2x32xf32>
    %293 = arith.negf %292 : vector<2x32xf32>
    %294 = math.exp %293 : vector<2x32xf32>
    %cst_100 = arith.constant 1.000000e+00 : f32
    %295 = vector.broadcast %cst_100 : f32 to vector<2x32xf32>
    %296 = arith.addf %295, %294 : vector<2x32xf32>
    %297 = arith.divf %295, %296 : vector<2x32xf32>
    %298 = vector.extract_strided_slice %277 {offsets = [0, 64], sizes = [2, 32], strides = [1, 1]} : vector<2x96xf32> to vector<2x32xf32>
    %299 = vector.extract_strided_slice %281 {offsets = [0, 64], sizes = [2, 32], strides = [1, 1]} : vector<2x96xf32> to vector<2x32xf32>
    %300 = arith.mulf %289, %299 : vector<2x32xf32>
    %301 = arith.addf %298, %300 : vector<2x32xf32>
    %302 = math.tanh %301 : vector<2x32xf32>
    %cst_101 = arith.constant 1.000000e+00 : f32
    %303 = vector.broadcast %cst_101 : f32 to vector<2x32xf32>
    %304 = arith.subf %303, %297 : vector<2x32xf32>
    %305 = arith.mulf %304, %302 : vector<2x32xf32>
    %306 = arith.mulf %297, %278 : vector<2x32xf32>
    %307 = arith.addf %305, %306 : vector<2x32xf32>
    %c0_102 = arith.constant 0 : index
    %c0_103 = arith.constant 0 : index
    %308 = vector.load %arg9[%c0_102, %c0_103] : memref<2x32xf32, #tpu.memory_space<vmem>>, vector<2x32xf32>
    tpu.vector_store %arg9[%c0_102, %c0_103], %273 {strides = array<i32>} : memref<2x32xf32, #tpu.memory_space<vmem>>, vector<2x32xf32>,
    %c0_104 = arith.constant 0 : index
    %c0_105 = arith.constant 0 : index
    %309 = vector.load %arg10[%c0_104, %c0_105] : memref<2x32xf32, #tpu.memory_space<vmem>>, vector<2x32xf32>
    tpu.vector_store %arg10[%c0_104, %c0_105], %307 {strides = array<i32>} : memref<2x32xf32, #tpu.memory_space<vmem>>, vector<2x32xf32>,
    %310 = arith.index_cast %c3_i32 : i32 to index
    %c0_106 = arith.constant 0 : index
    %c0_107 = arith.constant 0 : index
    %311 = vector.load %arg7[%310, %c0_106, %c0_107] : memref<8x2x32xf32, #tpu.memory_space<vmem>>, vector<1x2x32xf32>
    %312 = vector.shape_cast %311 : vector<1x2x32xf32> to vector<2x32xf32>
    %313 = vector.shape_cast %273 : vector<2x32xf32> to vector<1x2x32xf32>
    tpu.vector_store %arg7[%310, %c0_106, %c0_107], %313 {strides = array<i32>} : memref<8x2x32xf32, #tpu.memory_space<vmem>>, vector<1x2x32xf32>,
    %c7_i32_108 = arith.constant 7 : i32
    %314 = arith.subi %c7_i32_108, %c3_i32 : i32
    %315 = arith.index_cast %314 : i32 to index
    %c0_109 = arith.constant 0 : index
    %c0_110 = arith.constant 0 : index
    %316 = vector.load %arg8[%315, %c0_109, %c0_110] : memref<8x2x32xf32, #tpu.memory_space<vmem>>, vector<1x2x32xf32>
    %317 = vector.shape_cast %316 : vector<1x2x32xf32> to vector<2x32xf32>
    %318 = vector.shape_cast %307 : vector<2x32xf32> to vector<1x2x32xf32>
    tpu.vector_store %arg8[%315, %c0_109, %c0_110], %318 {strides = array<i32>} : memref<8x2x32xf32, #tpu.memory_space<vmem>>, vector<1x2x32xf32>,
    %c4_i32 = arith.constant 4 : i32
    %319 = arith.index_cast %c4_i32 : i32 to index
    %c0_111 = arith.constant 0 : index
    %c0_112 = arith.constant 0 : index
    %320 = vector.load %arg1[%319, %c0_111, %c0_112] : memref<8x2x96xf32, #tpu.memory_space<vmem>>, vector<1x2x96xf32>
    %321 = vector.shape_cast %320 : vector<1x2x96xf32> to vector<2x96xf32>
    %c0_113 = arith.constant 0 : index
    %c0_114 = arith.constant 0 : index
    %322 = vector.load %arg9[%c0_113, %c0_114] : memref<2x32xf32, #tpu.memory_space<vmem>>, vector<2x32xf32>
    %cst_115 = arith.constant dense<0.000000e+00> : vector<2x96xf32>
    %323 = tpu.matmul %322, %3, %cst_115 {dimension_numbers = #tpu.dot_dimension_numbers<[1], [0], [0], [1], [0, 0, 1, 1], [], []>} : vector<2x32xf32>, vector<32x96xf32>, vector<2x96xf32> -> vector<2x96xf32>
    %324 = vector.broadcast %5 : vector<1x96xf32> to vector<2x96xf32>
    %325 = arith.addf %323, %324 : vector<2x96xf32>
    %326 = vector.extract_strided_slice %321 {offsets = [0, 0], sizes = [2, 32], strides = [1, 1]} : vector<2x96xf32> to vector<2x32xf32>
    %327 = vector.extract_strided_slice %325 {offsets = [0, 0], sizes = [2, 32], strides = [1, 1]} : vector<2x96xf32> to vector<2x32xf32>
    %328 = arith.addf %326, %327 : vector<2x32xf32>
    %329 = arith.negf %328 : vector<2x32xf32>
    %330 = math.exp %329 : vector<2x32xf32>
    %cst_116 = arith.constant 1.000000e+00 : f32
    %331 = vector.broadcast %cst_116 : f32 to vector<2x32xf32>
    %332 = arith.addf %331, %330 : vector<2x32xf32>
    %333 = arith.divf %331, %332 : vector<2x32xf32>
    %334 = vector.extract_strided_slice %321 {offsets = [0, 32], sizes = [2, 32], strides = [1, 1]} : vector<2x96xf32> to vector<2x32xf32>
    %335 = vector.extract_strided_slice %325 {offsets = [0, 32], sizes = [2, 32], strides = [1, 1]} : vector<2x96xf32> to vector<2x32xf32>
    %336 = arith.addf %334, %335 : vector<2x32xf32>
    %337 = arith.negf %336 : vector<2x32xf32>
    %338 = math.exp %337 : vector<2x32xf32>
    %cst_117 = arith.constant 1.000000e+00 : f32
    %339 = vector.broadcast %cst_117 : f32 to vector<2x32xf32>
    %340 = arith.addf %339, %338 : vector<2x32xf32>
    %341 = arith.divf %339, %340 : vector<2x32xf32>
    %342 = vector.extract_strided_slice %321 {offsets = [0, 64], sizes = [2, 32], strides = [1, 1]} : vector<2x96xf32> to vector<2x32xf32>
    %343 = vector.extract_strided_slice %325 {offsets = [0, 64], sizes = [2, 32], strides = [1, 1]} : vector<2x96xf32> to vector<2x32xf32>
    %344 = arith.mulf %333, %343 : vector<2x32xf32>
    %345 = arith.addf %342, %344 : vector<2x32xf32>
    %346 = math.tanh %345 : vector<2x32xf32>
    %cst_118 = arith.constant 1.000000e+00 : f32
    %347 = vector.broadcast %cst_118 : f32 to vector<2x32xf32>
    %348 = arith.subf %347, %341 : vector<2x32xf32>
    %349 = arith.mulf %348, %346 : vector<2x32xf32>
    %350 = arith.mulf %341, %322 : vector<2x32xf32>
    %351 = arith.addf %349, %350 : vector<2x32xf32>
    %c7_i32_119 = arith.constant 7 : i32
    %352 = arith.subi %c7_i32_119, %c4_i32 : i32
    %353 = arith.index_cast %352 : i32 to index
    %c0_120 = arith.constant 0 : index
    %c0_121 = arith.constant 0 : index
    %354 = vector.load %arg2[%353, %c0_120, %c0_121] : memref<8x2x96xf32, #tpu.memory_space<vmem>>, vector<1x2x96xf32>
    %355 = vector.shape_cast %354 : vector<1x2x96xf32> to vector<2x96xf32>
    %c0_122 = arith.constant 0 : index
    %c0_123 = arith.constant 0 : index
    %356 = vector.load %arg10[%c0_122, %c0_123] : memref<2x32xf32, #tpu.memory_space<vmem>>, vector<2x32xf32>
    %cst_124 = arith.constant dense<0.000000e+00> : vector<2x96xf32>
    %357 = tpu.matmul %356, %4, %cst_124 {dimension_numbers = #tpu.dot_dimension_numbers<[1], [0], [0], [1], [0, 0, 1, 1], [], []>} : vector<2x32xf32>, vector<32x96xf32>, vector<2x96xf32> -> vector<2x96xf32>
    %358 = vector.broadcast %6 : vector<1x96xf32> to vector<2x96xf32>
    %359 = arith.addf %357, %358 : vector<2x96xf32>
    %360 = vector.extract_strided_slice %355 {offsets = [0, 0], sizes = [2, 32], strides = [1, 1]} : vector<2x96xf32> to vector<2x32xf32>
    %361 = vector.extract_strided_slice %359 {offsets = [0, 0], sizes = [2, 32], strides = [1, 1]} : vector<2x96xf32> to vector<2x32xf32>
    %362 = arith.addf %360, %361 : vector<2x32xf32>
    %363 = arith.negf %362 : vector<2x32xf32>
    %364 = math.exp %363 : vector<2x32xf32>
    %cst_125 = arith.constant 1.000000e+00 : f32
    %365 = vector.broadcast %cst_125 : f32 to vector<2x32xf32>
    %366 = arith.addf %365, %364 : vector<2x32xf32>
    %367 = arith.divf %365, %366 : vector<2x32xf32>
    %368 = vector.extract_strided_slice %355 {offsets = [0, 32], sizes = [2, 32], strides = [1, 1]} : vector<2x96xf32> to vector<2x32xf32>
    %369 = vector.extract_strided_slice %359 {offsets = [0, 32], sizes = [2, 32], strides = [1, 1]} : vector<2x96xf32> to vector<2x32xf32>
    %370 = arith.addf %368, %369 : vector<2x32xf32>
    %371 = arith.negf %370 : vector<2x32xf32>
    %372 = math.exp %371 : vector<2x32xf32>
    %cst_126 = arith.constant 1.000000e+00 : f32
    %373 = vector.broadcast %cst_126 : f32 to vector<2x32xf32>
    %374 = arith.addf %373, %372 : vector<2x32xf32>
    %375 = arith.divf %373, %374 : vector<2x32xf32>
    %376 = vector.extract_strided_slice %355 {offsets = [0, 64], sizes = [2, 32], strides = [1, 1]} : vector<2x96xf32> to vector<2x32xf32>
    %377 = vector.extract_strided_slice %359 {offsets = [0, 64], sizes = [2, 32], strides = [1, 1]} : vector<2x96xf32> to vector<2x32xf32>
    %378 = arith.mulf %367, %377 : vector<2x32xf32>
    %379 = arith.addf %376, %378 : vector<2x32xf32>
    %380 = math.tanh %379 : vector<2x32xf32>
    %cst_127 = arith.constant 1.000000e+00 : f32
    %381 = vector.broadcast %cst_127 : f32 to vector<2x32xf32>
    %382 = arith.subf %381, %375 : vector<2x32xf32>
    %383 = arith.mulf %382, %380 : vector<2x32xf32>
    %384 = arith.mulf %375, %356 : vector<2x32xf32>
    %385 = arith.addf %383, %384 : vector<2x32xf32>
    %c0_128 = arith.constant 0 : index
    %c0_129 = arith.constant 0 : index
    %386 = vector.load %arg9[%c0_128, %c0_129] : memref<2x32xf32, #tpu.memory_space<vmem>>, vector<2x32xf32>
    tpu.vector_store %arg9[%c0_128, %c0_129], %351 {strides = array<i32>} : memref<2x32xf32, #tpu.memory_space<vmem>>, vector<2x32xf32>,
    %c0_130 = arith.constant 0 : index
    %c0_131 = arith.constant 0 : index
    %387 = vector.load %arg10[%c0_130, %c0_131] : memref<2x32xf32, #tpu.memory_space<vmem>>, vector<2x32xf32>
    tpu.vector_store %arg10[%c0_130, %c0_131], %385 {strides = array<i32>} : memref<2x32xf32, #tpu.memory_space<vmem>>, vector<2x32xf32>,
    %388 = arith.index_cast %c4_i32 : i32 to index
    %c0_132 = arith.constant 0 : index
    %c0_133 = arith.constant 0 : index
    %389 = vector.load %arg7[%388, %c0_132, %c0_133] : memref<8x2x32xf32, #tpu.memory_space<vmem>>, vector<1x2x32xf32>
    %390 = vector.shape_cast %389 : vector<1x2x32xf32> to vector<2x32xf32>
    %391 = vector.shape_cast %351 : vector<2x32xf32> to vector<1x2x32xf32>
    tpu.vector_store %arg7[%388, %c0_132, %c0_133], %391 {strides = array<i32>} : memref<8x2x32xf32, #tpu.memory_space<vmem>>, vector<1x2x32xf32>,
    %c7_i32_134 = arith.constant 7 : i32
    %392 = arith.subi %c7_i32_134, %c4_i32 : i32
    %393 = arith.index_cast %392 : i32 to index
    %c0_135 = arith.constant 0 : index
    %c0_136 = arith.constant 0 : index
    %394 = vector.load %arg8[%393, %c0_135, %c0_136] : memref<8x2x32xf32, #tpu.memory_space<vmem>>, vector<1x2x32xf32>
    %395 = vector.shape_cast %394 : vector<1x2x32xf32> to vector<2x32xf32>
    %396 = vector.shape_cast %385 : vector<2x32xf32> to vector<1x2x32xf32>
    tpu.vector_store %arg8[%393, %c0_135, %c0_136], %396 {strides = array<i32>} : memref<8x2x32xf32, #tpu.memory_space<vmem>>, vector<1x2x32xf32>,
    %c5_i32 = arith.constant 5 : i32
    %397 = arith.index_cast %c5_i32 : i32 to index
    %c0_137 = arith.constant 0 : index
    %c0_138 = arith.constant 0 : index
    %398 = vector.load %arg1[%397, %c0_137, %c0_138] : memref<8x2x96xf32, #tpu.memory_space<vmem>>, vector<1x2x96xf32>
    %399 = vector.shape_cast %398 : vector<1x2x96xf32> to vector<2x96xf32>
    %c0_139 = arith.constant 0 : index
    %c0_140 = arith.constant 0 : index
    %400 = vector.load %arg9[%c0_139, %c0_140] : memref<2x32xf32, #tpu.memory_space<vmem>>, vector<2x32xf32>
    %cst_141 = arith.constant dense<0.000000e+00> : vector<2x96xf32>
    %401 = tpu.matmul %400, %3, %cst_141 {dimension_numbers = #tpu.dot_dimension_numbers<[1], [0], [0], [1], [0, 0, 1, 1], [], []>} : vector<2x32xf32>, vector<32x96xf32>, vector<2x96xf32> -> vector<2x96xf32>
    %402 = vector.broadcast %5 : vector<1x96xf32> to vector<2x96xf32>
    %403 = arith.addf %401, %402 : vector<2x96xf32>
    %404 = vector.extract_strided_slice %399 {offsets = [0, 0], sizes = [2, 32], strides = [1, 1]} : vector<2x96xf32> to vector<2x32xf32>
    %405 = vector.extract_strided_slice %403 {offsets = [0, 0], sizes = [2, 32], strides = [1, 1]} : vector<2x96xf32> to vector<2x32xf32>
    %406 = arith.addf %404, %405 : vector<2x32xf32>
    %407 = arith.negf %406 : vector<2x32xf32>
    %408 = math.exp %407 : vector<2x32xf32>
    %cst_142 = arith.constant 1.000000e+00 : f32
    %409 = vector.broadcast %cst_142 : f32 to vector<2x32xf32>
    %410 = arith.addf %409, %408 : vector<2x32xf32>
    %411 = arith.divf %409, %410 : vector<2x32xf32>
    %412 = vector.extract_strided_slice %399 {offsets = [0, 32], sizes = [2, 32], strides = [1, 1]} : vector<2x96xf32> to vector<2x32xf32>
    %413 = vector.extract_strided_slice %403 {offsets = [0, 32], sizes = [2, 32], strides = [1, 1]} : vector<2x96xf32> to vector<2x32xf32>
    %414 = arith.addf %412, %413 : vector<2x32xf32>
    %415 = arith.negf %414 : vector<2x32xf32>
    %416 = math.exp %415 : vector<2x32xf32>
    %cst_143 = arith.constant 1.000000e+00 : f32
    %417 = vector.broadcast %cst_143 : f32 to vector<2x32xf32>
    %418 = arith.addf %417, %416 : vector<2x32xf32>
    %419 = arith.divf %417, %418 : vector<2x32xf32>
    %420 = vector.extract_strided_slice %399 {offsets = [0, 64], sizes = [2, 32], strides = [1, 1]} : vector<2x96xf32> to vector<2x32xf32>
    %421 = vector.extract_strided_slice %403 {offsets = [0, 64], sizes = [2, 32], strides = [1, 1]} : vector<2x96xf32> to vector<2x32xf32>
    %422 = arith.mulf %411, %421 : vector<2x32xf32>
    %423 = arith.addf %420, %422 : vector<2x32xf32>
    %424 = math.tanh %423 : vector<2x32xf32>
    %cst_144 = arith.constant 1.000000e+00 : f32
    %425 = vector.broadcast %cst_144 : f32 to vector<2x32xf32>
    %426 = arith.subf %425, %419 : vector<2x32xf32>
    %427 = arith.mulf %426, %424 : vector<2x32xf32>
    %428 = arith.mulf %419, %400 : vector<2x32xf32>
    %429 = arith.addf %427, %428 : vector<2x32xf32>
    %c7_i32_145 = arith.constant 7 : i32
    %430 = arith.subi %c7_i32_145, %c5_i32 : i32
    %431 = arith.index_cast %430 : i32 to index
    %c0_146 = arith.constant 0 : index
    %c0_147 = arith.constant 0 : index
    %432 = vector.load %arg2[%431, %c0_146, %c0_147] : memref<8x2x96xf32, #tpu.memory_space<vmem>>, vector<1x2x96xf32>
    %433 = vector.shape_cast %432 : vector<1x2x96xf32> to vector<2x96xf32>
    %c0_148 = arith.constant 0 : index
    %c0_149 = arith.constant 0 : index
    %434 = vector.load %arg10[%c0_148, %c0_149] : memref<2x32xf32, #tpu.memory_space<vmem>>, vector<2x32xf32>
    %cst_150 = arith.constant dense<0.000000e+00> : vector<2x96xf32>
    %435 = tpu.matmul %434, %4, %cst_150 {dimension_numbers = #tpu.dot_dimension_numbers<[1], [0], [0], [1], [0, 0, 1, 1], [], []>} : vector<2x32xf32>, vector<32x96xf32>, vector<2x96xf32> -> vector<2x96xf32>
    %436 = vector.broadcast %6 : vector<1x96xf32> to vector<2x96xf32>
    %437 = arith.addf %435, %436 : vector<2x96xf32>
    %438 = vector.extract_strided_slice %433 {offsets = [0, 0], sizes = [2, 32], strides = [1, 1]} : vector<2x96xf32> to vector<2x32xf32>
    %439 = vector.extract_strided_slice %437 {offsets = [0, 0], sizes = [2, 32], strides = [1, 1]} : vector<2x96xf32> to vector<2x32xf32>
    %440 = arith.addf %438, %439 : vector<2x32xf32>
    %441 = arith.negf %440 : vector<2x32xf32>
    %442 = math.exp %441 : vector<2x32xf32>
    %cst_151 = arith.constant 1.000000e+00 : f32
    %443 = vector.broadcast %cst_151 : f32 to vector<2x32xf32>
    %444 = arith.addf %443, %442 : vector<2x32xf32>
    %445 = arith.divf %443, %444 : vector<2x32xf32>
    %446 = vector.extract_strided_slice %433 {offsets = [0, 32], sizes = [2, 32], strides = [1, 1]} : vector<2x96xf32> to vector<2x32xf32>
    %447 = vector.extract_strided_slice %437 {offsets = [0, 32], sizes = [2, 32], strides = [1, 1]} : vector<2x96xf32> to vector<2x32xf32>
    %448 = arith.addf %446, %447 : vector<2x32xf32>
    %449 = arith.negf %448 : vector<2x32xf32>
    %450 = math.exp %449 : vector<2x32xf32>
    %cst_152 = arith.constant 1.000000e+00 : f32
    %451 = vector.broadcast %cst_152 : f32 to vector<2x32xf32>
    %452 = arith.addf %451, %450 : vector<2x32xf32>
    %453 = arith.divf %451, %452 : vector<2x32xf32>
    %454 = vector.extract_strided_slice %433 {offsets = [0, 64], sizes = [2, 32], strides = [1, 1]} : vector<2x96xf32> to vector<2x32xf32>
    %455 = vector.extract_strided_slice %437 {offsets = [0, 64], sizes = [2, 32], strides = [1, 1]} : vector<2x96xf32> to vector<2x32xf32>
    %456 = arith.mulf %445, %455 : vector<2x32xf32>
    %457 = arith.addf %454, %456 : vector<2x32xf32>
    %458 = math.tanh %457 : vector<2x32xf32>
    %cst_153 = arith.constant 1.000000e+00 : f32
    %459 = vector.broadcast %cst_153 : f32 to vector<2x32xf32>
    %460 = arith.subf %459, %453 : vector<2x32xf32>
    %461 = arith.mulf %460, %458 : vector<2x32xf32>
    %462 = arith.mulf %453, %434 : vector<2x32xf32>
    %463 = arith.addf %461, %462 : vector<2x32xf32>
    %c0_154 = arith.constant 0 : index
    %c0_155 = arith.constant 0 : index
    %464 = vector.load %arg9[%c0_154, %c0_155] : memref<2x32xf32, #tpu.memory_space<vmem>>, vector<2x32xf32>
    tpu.vector_store %arg9[%c0_154, %c0_155], %429 {strides = array<i32>} : memref<2x32xf32, #tpu.memory_space<vmem>>, vector<2x32xf32>,
    %c0_156 = arith.constant 0 : index
    %c0_157 = arith.constant 0 : index
    %465 = vector.load %arg10[%c0_156, %c0_157] : memref<2x32xf32, #tpu.memory_space<vmem>>, vector<2x32xf32>
    tpu.vector_store %arg10[%c0_156, %c0_157], %463 {strides = array<i32>} : memref<2x32xf32, #tpu.memory_space<vmem>>, vector<2x32xf32>,
    %466 = arith.index_cast %c5_i32 : i32 to index
    %c0_158 = arith.constant 0 : index
    %c0_159 = arith.constant 0 : index
    %467 = vector.load %arg7[%466, %c0_158, %c0_159] : memref<8x2x32xf32, #tpu.memory_space<vmem>>, vector<1x2x32xf32>
    %468 = vector.shape_cast %467 : vector<1x2x32xf32> to vector<2x32xf32>
    %469 = vector.shape_cast %429 : vector<2x32xf32> to vector<1x2x32xf32>
    tpu.vector_store %arg7[%466, %c0_158, %c0_159], %469 {strides = array<i32>} : memref<8x2x32xf32, #tpu.memory_space<vmem>>, vector<1x2x32xf32>,
    %c7_i32_160 = arith.constant 7 : i32
    %470 = arith.subi %c7_i32_160, %c5_i32 : i32
    %471 = arith.index_cast %470 : i32 to index
    %c0_161 = arith.constant 0 : index
    %c0_162 = arith.constant 0 : index
    %472 = vector.load %arg8[%471, %c0_161, %c0_162] : memref<8x2x32xf32, #tpu.memory_space<vmem>>, vector<1x2x32xf32>
    %473 = vector.shape_cast %472 : vector<1x2x32xf32> to vector<2x32xf32>
    %474 = vector.shape_cast %463 : vector<2x32xf32> to vector<1x2x32xf32>
    tpu.vector_store %arg8[%471, %c0_161, %c0_162], %474 {strides = array<i32>} : memref<8x2x32xf32, #tpu.memory_space<vmem>>, vector<1x2x32xf32>,
    %c6_i32 = arith.constant 6 : i32
    %475 = arith.index_cast %c6_i32 : i32 to index
    %c0_163 = arith.constant 0 : index
    %c0_164 = arith.constant 0 : index
    %476 = vector.load %arg1[%475, %c0_163, %c0_164] : memref<8x2x96xf32, #tpu.memory_space<vmem>>, vector<1x2x96xf32>
    %477 = vector.shape_cast %476 : vector<1x2x96xf32> to vector<2x96xf32>
    %c0_165 = arith.constant 0 : index
    %c0_166 = arith.constant 0 : index
    %478 = vector.load %arg9[%c0_165, %c0_166] : memref<2x32xf32, #tpu.memory_space<vmem>>, vector<2x32xf32>
    %cst_167 = arith.constant dense<0.000000e+00> : vector<2x96xf32>
    %479 = tpu.matmul %478, %3, %cst_167 {dimension_numbers = #tpu.dot_dimension_numbers<[1], [0], [0], [1], [0, 0, 1, 1], [], []>} : vector<2x32xf32>, vector<32x96xf32>, vector<2x96xf32> -> vector<2x96xf32>
    %480 = vector.broadcast %5 : vector<1x96xf32> to vector<2x96xf32>
    %481 = arith.addf %479, %480 : vector<2x96xf32>
    %482 = vector.extract_strided_slice %477 {offsets = [0, 0], sizes = [2, 32], strides = [1, 1]} : vector<2x96xf32> to vector<2x32xf32>
    %483 = vector.extract_strided_slice %481 {offsets = [0, 0], sizes = [2, 32], strides = [1, 1]} : vector<2x96xf32> to vector<2x32xf32>
    %484 = arith.addf %482, %483 : vector<2x32xf32>
    %485 = arith.negf %484 : vector<2x32xf32>
    %486 = math.exp %485 : vector<2x32xf32>
    %cst_168 = arith.constant 1.000000e+00 : f32
    %487 = vector.broadcast %cst_168 : f32 to vector<2x32xf32>
    %488 = arith.addf %487, %486 : vector<2x32xf32>
    %489 = arith.divf %487, %488 : vector<2x32xf32>
    %490 = vector.extract_strided_slice %477 {offsets = [0, 32], sizes = [2, 32], strides = [1, 1]} : vector<2x96xf32> to vector<2x32xf32>
    %491 = vector.extract_strided_slice %481 {offsets = [0, 32], sizes = [2, 32], strides = [1, 1]} : vector<2x96xf32> to vector<2x32xf32>
    %492 = arith.addf %490, %491 : vector<2x32xf32>
    %493 = arith.negf %492 : vector<2x32xf32>
    %494 = math.exp %493 : vector<2x32xf32>
    %cst_169 = arith.constant 1.000000e+00 : f32
    %495 = vector.broadcast %cst_169 : f32 to vector<2x32xf32>
    %496 = arith.addf %495, %494 : vector<2x32xf32>
    %497 = arith.divf %495, %496 : vector<2x32xf32>
    %498 = vector.extract_strided_slice %477 {offsets = [0, 64], sizes = [2, 32], strides = [1, 1]} : vector<2x96xf32> to vector<2x32xf32>
    %499 = vector.extract_strided_slice %481 {offsets = [0, 64], sizes = [2, 32], strides = [1, 1]} : vector<2x96xf32> to vector<2x32xf32>
    %500 = arith.mulf %489, %499 : vector<2x32xf32>
    %501 = arith.addf %498, %500 : vector<2x32xf32>
    %502 = math.tanh %501 : vector<2x32xf32>
    %cst_170 = arith.constant 1.000000e+00 : f32
    %503 = vector.broadcast %cst_170 : f32 to vector<2x32xf32>
    %504 = arith.subf %503, %497 : vector<2x32xf32>
    %505 = arith.mulf %504, %502 : vector<2x32xf32>
    %506 = arith.mulf %497, %478 : vector<2x32xf32>
    %507 = arith.addf %505, %506 : vector<2x32xf32>
    %c7_i32_171 = arith.constant 7 : i32
    %508 = arith.subi %c7_i32_171, %c6_i32 : i32
    %509 = arith.index_cast %508 : i32 to index
    %c0_172 = arith.constant 0 : index
    %c0_173 = arith.constant 0 : index
    %510 = vector.load %arg2[%509, %c0_172, %c0_173] : memref<8x2x96xf32, #tpu.memory_space<vmem>>, vector<1x2x96xf32>
    %511 = vector.shape_cast %510 : vector<1x2x96xf32> to vector<2x96xf32>
    %c0_174 = arith.constant 0 : index
    %c0_175 = arith.constant 0 : index
    %512 = vector.load %arg10[%c0_174, %c0_175] : memref<2x32xf32, #tpu.memory_space<vmem>>, vector<2x32xf32>
    %cst_176 = arith.constant dense<0.000000e+00> : vector<2x96xf32>
    %513 = tpu.matmul %512, %4, %cst_176 {dimension_numbers = #tpu.dot_dimension_numbers<[1], [0], [0], [1], [0, 0, 1, 1], [], []>} : vector<2x32xf32>, vector<32x96xf32>, vector<2x96xf32> -> vector<2x96xf32>
    %514 = vector.broadcast %6 : vector<1x96xf32> to vector<2x96xf32>
    %515 = arith.addf %513, %514 : vector<2x96xf32>
    %516 = vector.extract_strided_slice %511 {offsets = [0, 0], sizes = [2, 32], strides = [1, 1]} : vector<2x96xf32> to vector<2x32xf32>
    %517 = vector.extract_strided_slice %515 {offsets = [0, 0], sizes = [2, 32], strides = [1, 1]} : vector<2x96xf32> to vector<2x32xf32>
    %518 = arith.addf %516, %517 : vector<2x32xf32>
    %519 = arith.negf %518 : vector<2x32xf32>
    %520 = math.exp %519 : vector<2x32xf32>
    %cst_177 = arith.constant 1.000000e+00 : f32
    %521 = vector.broadcast %cst_177 : f32 to vector<2x32xf32>
    %522 = arith.addf %521, %520 : vector<2x32xf32>
    %523 = arith.divf %521, %522 : vector<2x32xf32>
    %524 = vector.extract_strided_slice %511 {offsets = [0, 32], sizes = [2, 32], strides = [1, 1]} : vector<2x96xf32> to vector<2x32xf32>
    %525 = vector.extract_strided_slice %515 {offsets = [0, 32], sizes = [2, 32], strides = [1, 1]} : vector<2x96xf32> to vector<2x32xf32>
    %526 = arith.addf %524, %525 : vector<2x32xf32>
    %527 = arith.negf %526 : vector<2x32xf32>
    %528 = math.exp %527 : vector<2x32xf32>
    %cst_178 = arith.constant 1.000000e+00 : f32
    %529 = vector.broadcast %cst_178 : f32 to vector<2x32xf32>
    %530 = arith.addf %529, %528 : vector<2x32xf32>
    %531 = arith.divf %529, %530 : vector<2x32xf32>
    %532 = vector.extract_strided_slice %511 {offsets = [0, 64], sizes = [2, 32], strides = [1, 1]} : vector<2x96xf32> to vector<2x32xf32>
    %533 = vector.extract_strided_slice %515 {offsets = [0, 64], sizes = [2, 32], strides = [1, 1]} : vector<2x96xf32> to vector<2x32xf32>
    %534 = arith.mulf %523, %533 : vector<2x32xf32>
    %535 = arith.addf %532, %534 : vector<2x32xf32>
    %536 = math.tanh %535 : vector<2x32xf32>
    %cst_179 = arith.constant 1.000000e+00 : f32
    %537 = vector.broadcast %cst_179 : f32 to vector<2x32xf32>
    %538 = arith.subf %537, %531 : vector<2x32xf32>
    %539 = arith.mulf %538, %536 : vector<2x32xf32>
    %540 = arith.mulf %531, %512 : vector<2x32xf32>
    %541 = arith.addf %539, %540 : vector<2x32xf32>
    %c0_180 = arith.constant 0 : index
    %c0_181 = arith.constant 0 : index
    %542 = vector.load %arg9[%c0_180, %c0_181] : memref<2x32xf32, #tpu.memory_space<vmem>>, vector<2x32xf32>
    tpu.vector_store %arg9[%c0_180, %c0_181], %507 {strides = array<i32>} : memref<2x32xf32, #tpu.memory_space<vmem>>, vector<2x32xf32>,
    %c0_182 = arith.constant 0 : index
    %c0_183 = arith.constant 0 : index
    %543 = vector.load %arg10[%c0_182, %c0_183] : memref<2x32xf32, #tpu.memory_space<vmem>>, vector<2x32xf32>
    tpu.vector_store %arg10[%c0_182, %c0_183], %541 {strides = array<i32>} : memref<2x32xf32, #tpu.memory_space<vmem>>, vector<2x32xf32>,
    %544 = arith.index_cast %c6_i32 : i32 to index
    %c0_184 = arith.constant 0 : index
    %c0_185 = arith.constant 0 : index
    %545 = vector.load %arg7[%544, %c0_184, %c0_185] : memref<8x2x32xf32, #tpu.memory_space<vmem>>, vector<1x2x32xf32>
    %546 = vector.shape_cast %545 : vector<1x2x32xf32> to vector<2x32xf32>
    %547 = vector.shape_cast %507 : vector<2x32xf32> to vector<1x2x32xf32>
    tpu.vector_store %arg7[%544, %c0_184, %c0_185], %547 {strides = array<i32>} : memref<8x2x32xf32, #tpu.memory_space<vmem>>, vector<1x2x32xf32>,
    %c7_i32_186 = arith.constant 7 : i32
    %548 = arith.subi %c7_i32_186, %c6_i32 : i32
    %549 = arith.index_cast %548 : i32 to index
    %c0_187 = arith.constant 0 : index
    %c0_188 = arith.constant 0 : index
    %550 = vector.load %arg8[%549, %c0_187, %c0_188] : memref<8x2x32xf32, #tpu.memory_space<vmem>>, vector<1x2x32xf32>
    %551 = vector.shape_cast %550 : vector<1x2x32xf32> to vector<2x32xf32>
    %552 = vector.shape_cast %541 : vector<2x32xf32> to vector<1x2x32xf32>
    tpu.vector_store %arg8[%549, %c0_187, %c0_188], %552 {strides = array<i32>} : memref<8x2x32xf32, #tpu.memory_space<vmem>>, vector<1x2x32xf32>,
    %c7_i32_189 = arith.constant 7 : i32
    %553 = arith.index_cast %c7_i32_189 : i32 to index
    %c0_190 = arith.constant 0 : index
    %c0_191 = arith.constant 0 : index
    %554 = vector.load %arg1[%553, %c0_190, %c0_191] : memref<8x2x96xf32, #tpu.memory_space<vmem>>, vector<1x2x96xf32>
    %555 = vector.shape_cast %554 : vector<1x2x96xf32> to vector<2x96xf32>
    %c0_192 = arith.constant 0 : index
    %c0_193 = arith.constant 0 : index
    %556 = vector.load %arg9[%c0_192, %c0_193] : memref<2x32xf32, #tpu.memory_space<vmem>>, vector<2x32xf32>
    %cst_194 = arith.constant dense<0.000000e+00> : vector<2x96xf32>
    %557 = tpu.matmul %556, %3, %cst_194 {dimension_numbers = #tpu.dot_dimension_numbers<[1], [0], [0], [1], [0, 0, 1, 1], [], []>} : vector<2x32xf32>, vector<32x96xf32>, vector<2x96xf32> -> vector<2x96xf32>
    %558 = vector.broadcast %5 : vector<1x96xf32> to vector<2x96xf32>
    %559 = arith.addf %557, %558 : vector<2x96xf32>
    %560 = vector.extract_strided_slice %555 {offsets = [0, 0], sizes = [2, 32], strides = [1, 1]} : vector<2x96xf32> to vector<2x32xf32>
    %561 = vector.extract_strided_slice %559 {offsets = [0, 0], sizes = [2, 32], strides = [1, 1]} : vector<2x96xf32> to vector<2x32xf32>
    %562 = arith.addf %560, %561 : vector<2x32xf32>
    %563 = arith.negf %562 : vector<2x32xf32>
    %564 = math.exp %563 : vector<2x32xf32>
    %cst_195 = arith.constant 1.000000e+00 : f32
    %565 = vector.broadcast %cst_195 : f32 to vector<2x32xf32>
    %566 = arith.addf %565, %564 : vector<2x32xf32>
    %567 = arith.divf %565, %566 : vector<2x32xf32>
    %568 = vector.extract_strided_slice %555 {offsets = [0, 32], sizes = [2, 32], strides = [1, 1]} : vector<2x96xf32> to vector<2x32xf32>
    %569 = vector.extract_strided_slice %559 {offsets = [0, 32], sizes = [2, 32], strides = [1, 1]} : vector<2x96xf32> to vector<2x32xf32>
    %570 = arith.addf %568, %569 : vector<2x32xf32>
    %571 = arith.negf %570 : vector<2x32xf32>
    %572 = math.exp %571 : vector<2x32xf32>
    %cst_196 = arith.constant 1.000000e+00 : f32
    %573 = vector.broadcast %cst_196 : f32 to vector<2x32xf32>
    %574 = arith.addf %573, %572 : vector<2x32xf32>
    %575 = arith.divf %573, %574 : vector<2x32xf32>
    %576 = vector.extract_strided_slice %555 {offsets = [0, 64], sizes = [2, 32], strides = [1, 1]} : vector<2x96xf32> to vector<2x32xf32>
    %577 = vector.extract_strided_slice %559 {offsets = [0, 64], sizes = [2, 32], strides = [1, 1]} : vector<2x96xf32> to vector<2x32xf32>
    %578 = arith.mulf %567, %577 : vector<2x32xf32>
    %579 = arith.addf %576, %578 : vector<2x32xf32>
    %580 = math.tanh %579 : vector<2x32xf32>
    %cst_197 = arith.constant 1.000000e+00 : f32
    %581 = vector.broadcast %cst_197 : f32 to vector<2x32xf32>
    %582 = arith.subf %581, %575 : vector<2x32xf32>
    %583 = arith.mulf %582, %580 : vector<2x32xf32>
    %584 = arith.mulf %575, %556 : vector<2x32xf32>
    %585 = arith.addf %583, %584 : vector<2x32xf32>
    %c7_i32_198 = arith.constant 7 : i32
    %586 = arith.subi %c7_i32_198, %c7_i32_189 : i32
    %587 = arith.index_cast %586 : i32 to index
    %c0_199 = arith.constant 0 : index
    %c0_200 = arith.constant 0 : index
    %588 = vector.load %arg2[%587, %c0_199, %c0_200] : memref<8x2x96xf32, #tpu.memory_space<vmem>>, vector<1x2x96xf32>
    %589 = vector.shape_cast %588 : vector<1x2x96xf32> to vector<2x96xf32>
    %c0_201 = arith.constant 0 : index
    %c0_202 = arith.constant 0 : index
    %590 = vector.load %arg10[%c0_201, %c0_202] : memref<2x32xf32, #tpu.memory_space<vmem>>, vector<2x32xf32>
    %cst_203 = arith.constant dense<0.000000e+00> : vector<2x96xf32>
    %591 = tpu.matmul %590, %4, %cst_203 {dimension_numbers = #tpu.dot_dimension_numbers<[1], [0], [0], [1], [0, 0, 1, 1], [], []>} : vector<2x32xf32>, vector<32x96xf32>, vector<2x96xf32> -> vector<2x96xf32>
    %592 = vector.broadcast %6 : vector<1x96xf32> to vector<2x96xf32>
    %593 = arith.addf %591, %592 : vector<2x96xf32>
    %594 = vector.extract_strided_slice %589 {offsets = [0, 0], sizes = [2, 32], strides = [1, 1]} : vector<2x96xf32> to vector<2x32xf32>
    %595 = vector.extract_strided_slice %593 {offsets = [0, 0], sizes = [2, 32], strides = [1, 1]} : vector<2x96xf32> to vector<2x32xf32>
    %596 = arith.addf %594, %595 : vector<2x32xf32>
    %597 = arith.negf %596 : vector<2x32xf32>
    %598 = math.exp %597 : vector<2x32xf32>
    %cst_204 = arith.constant 1.000000e+00 : f32
    %599 = vector.broadcast %cst_204 : f32 to vector<2x32xf32>
    %600 = arith.addf %599, %598 : vector<2x32xf32>
    %601 = arith.divf %599, %600 : vector<2x32xf32>
    %602 = vector.extract_strided_slice %589 {offsets = [0, 32], sizes = [2, 32], strides = [1, 1]} : vector<2x96xf32> to vector<2x32xf32>
    %603 = vector.extract_strided_slice %593 {offsets = [0, 32], sizes = [2, 32], strides = [1, 1]} : vector<2x96xf32> to vector<2x32xf32>
    %604 = arith.addf %602, %603 : vector<2x32xf32>
    %605 = arith.negf %604 : vector<2x32xf32>
    %606 = math.exp %605 : vector<2x32xf32>
    %cst_205 = arith.constant 1.000000e+00 : f32
    %607 = vector.broadcast %cst_205 : f32 to vector<2x32xf32>
    %608 = arith.addf %607, %606 : vector<2x32xf32>
    %609 = arith.divf %607, %608 : vector<2x32xf32>
    %610 = vector.extract_strided_slice %589 {offsets = [0, 64], sizes = [2, 32], strides = [1, 1]} : vector<2x96xf32> to vector<2x32xf32>
    %611 = vector.extract_strided_slice %593 {offsets = [0, 64], sizes = [2, 32], strides = [1, 1]} : vector<2x96xf32> to vector<2x32xf32>
    %612 = arith.mulf %601, %611 : vector<2x32xf32>
    %613 = arith.addf %610, %612 : vector<2x32xf32>
    %614 = math.tanh %613 : vector<2x32xf32>
    %cst_206 = arith.constant 1.000000e+00 : f32
    %615 = vector.broadcast %cst_206 : f32 to vector<2x32xf32>
    %616 = arith.subf %615, %609 : vector<2x32xf32>
    %617 = arith.mulf %616, %614 : vector<2x32xf32>
    %618 = arith.mulf %609, %590 : vector<2x32xf32>
    %619 = arith.addf %617, %618 : vector<2x32xf32>
    %c0_207 = arith.constant 0 : index
    %c0_208 = arith.constant 0 : index
    %620 = vector.load %arg9[%c0_207, %c0_208] : memref<2x32xf32, #tpu.memory_space<vmem>>, vector<2x32xf32>
    tpu.vector_store %arg9[%c0_207, %c0_208], %585 {strides = array<i32>} : memref<2x32xf32, #tpu.memory_space<vmem>>, vector<2x32xf32>,
    %c0_209 = arith.constant 0 : index
    %c0_210 = arith.constant 0 : index
    %621 = vector.load %arg10[%c0_209, %c0_210] : memref<2x32xf32, #tpu.memory_space<vmem>>, vector<2x32xf32>
    tpu.vector_store %arg10[%c0_209, %c0_210], %619 {strides = array<i32>} : memref<2x32xf32, #tpu.memory_space<vmem>>, vector<2x32xf32>,
    %622 = arith.index_cast %c7_i32_189 : i32 to index
    %c0_211 = arith.constant 0 : index
    %c0_212 = arith.constant 0 : index
    %623 = vector.load %arg7[%622, %c0_211, %c0_212] : memref<8x2x32xf32, #tpu.memory_space<vmem>>, vector<1x2x32xf32>
    %624 = vector.shape_cast %623 : vector<1x2x32xf32> to vector<2x32xf32>
    %625 = vector.shape_cast %585 : vector<2x32xf32> to vector<1x2x32xf32>
    tpu.vector_store %arg7[%622, %c0_211, %c0_212], %625 {strides = array<i32>} : memref<8x2x32xf32, #tpu.memory_space<vmem>>, vector<1x2x32xf32>,
    %c7_i32_213 = arith.constant 7 : i32
    %626 = arith.subi %c7_i32_213, %c7_i32_189 : i32
    %627 = arith.index_cast %626 : i32 to index
    %c0_214 = arith.constant 0 : index
    %c0_215 = arith.constant 0 : index
    %628 = vector.load %arg8[%627, %c0_214, %c0_215] : memref<8x2x32xf32, #tpu.memory_space<vmem>>, vector<1x2x32xf32>
    %629 = vector.shape_cast %628 : vector<1x2x32xf32> to vector<2x32xf32>
    %630 = vector.shape_cast %619 : vector<2x32xf32> to vector<1x2x32xf32>
    tpu.vector_store %arg8[%627, %c0_214, %c0_215], %630 {strides = array<i32>} : memref<8x2x32xf32, #tpu.memory_space<vmem>>, vector<1x2x32xf32>,
    %c8_i32 = arith.constant 8 : i32
    return
  }
  func.func @transform_0(%arg0: i32) -> (i32, i32, i32) {
    %c0_i32 = arith.constant 0 : i32
    %c0_i32_0 = arith.constant 0 : i32
    %c0_i32_1 = arith.constant 0 : i32
    return %arg0, %c0_i32, %c0_i32_0 : i32, i32, i32
  }
  func.func @transform_1(%arg0: i32) -> (i32, i32, i32) {
    %c0_i32 = arith.constant 0 : i32
    %0 = arith.subi %c0_i32, %arg0 : i32
    %c0_i32_0 = arith.constant 0 : i32
    %c0_i32_1 = arith.constant 0 : i32
    %c0_i32_2 = arith.constant 0 : i32
    return %0, %c0_i32_0, %c0_i32_1 : i32, i32, i32
  }
  func.func @transform_2(%arg0: i32) -> (i32, i32) {
    %c0_i32 = arith.constant 0 : i32
    %c0_i32_0 = arith.constant 0 : i32
    %c0_i32_1 = arith.constant 0 : i32
    return %c0_i32, %c0_i32_0 : i32, i32
  }
  func.func @transform_3(%arg0: i32) -> (i32, i32) {
    %c0_i32 = arith.constant 0 : i32
    %c0_i32_0 = arith.constant 0 : i32
    %c0_i32_1 = arith.constant 0 : i32
    return %c0_i32, %c0_i32_0 : i32, i32
  }
  func.func @transform_4(%arg0: i32) -> (i32, i32) {
    %c0_i32 = arith.constant 0 : i32
    %c0_i32_0 = arith.constant 0 : i32
    %c0_i32_1 = arith.constant 0 : i32
    return %c0_i32, %c0_i32_0 : i32, i32
  }
  func.func @transform_5(%arg0: i32) -> (i32, i32) {
    %c0_i32 = arith.constant 0 : i32
    %c0_i32_0 = arith.constant 0 : i32
    %c0_i32_1 = arith.constant 0 : i32
    return %c0_i32, %c0_i32_0 : i32, i32
  }
  func.func @transform_6(%arg0: i32) -> (i32, i32, i32) {
    %c0_i32 = arith.constant 0 : i32
    %c0_i32_0 = arith.constant 0 : i32
    %c0_i32_1 = arith.constant 0 : i32
    return %arg0, %c0_i32, %c0_i32_0 : i32, i32, i32
  }
  func.func @transform_7(%arg0: i32) -> (i32, i32, i32) {
    %c0_i32 = arith.constant 0 : i32
    %0 = arith.subi %c0_i32, %arg0 : i32
    %c0_i32_0 = arith.constant 0 : i32
    %c0_i32_1 = arith.constant 0 : i32
    %c0_i32_2 = arith.constant 0 : i32
    return %0, %c0_i32_0, %c0_i32_1 : i32, i32, i32
  }
}

</mosaic_0001>

<bundles_post_ra>
// kernel: rnn_layer_forward.1
= control target key start
LH: loop header
LB: loop body
LE: loop exit
PB: predicated region body
PF: predicated region fallthrough
CT: control target
= control target key end

     0   :  { %vm65_vm0 = vcmask 254976   ;;  %v2345_v0 = vmov 0.0   ;;  %vm2346_vm1 = vmmov 0   ;;  %vm86_vm2 = vcmask 261120   ;;  %s2347_s21 = smov 64   ;;  %s2348_s26 = smov 32   ;;  %s2878_s2 = inlined_call_operand.vmem [shape: f32[32,96], index: 2, kind: input, shape index: {}]   ;;  %s2879_s3 = inlined_call_operand.vmem [shape: f32[32,96], index: 3, kind: input, shape index: {}]   ;;  %s2880_s4 = inlined_call_operand.vmem [shape: f32[1,96], index: 4, kind: input, shape index: {}]   ;;  %s2881_s5 = inlined_call_operand.vmem [shape: f32[1,96], index: 5, kind: input, shape index: {}]   ;;  %s2882_s0 = inlined_call_operand.vmem [shape: f32[8,2,96], index: 0, kind: input, shape index: {}]   ;;  %s2883_s1 = inlined_call_operand.vmem [shape: f32[8,2,96], index: 1, kind: input, shape index: {}]   ;;  %s2884_s6 = inlined_call_operand.vmem [shape: f32[8,2,32], index: 6, kind: output, shape index: {0}]   ;;  %s2885_s7 = inlined_call_operand.vmem [shape: f32[8,2,32], index: 7, kind: output, shape index: {1}]  }
   0x1   :  { %2058 = vmatprep.subr.mxu0 %v2345_v0  ;;  %v2394_v1 = vld [vmem:[%s2878_s2 + $0x18] sm:$0xff]  ;;  %2069 = vmatprep.subr.mxu1 %v2345_v0  ;;  %v2400_v2 = vld [vmem:[%s2878_s2 + $0x10] sm:$0xff]  ;;  %66 = vst.msk [vmem:[#allocation2] sm:$0x3] %vm65_vm0, %v2345_v0  ;;  %67 = vst.msk [vmem:[#allocation3] sm:$0x3] %vm65_vm0, %v2345_v0 }
   0x2   :  { %v2405_v3 = vld [vmem:[%s2879_s3 + $0x18] sm:$0xff]  ;;  %2059 = vmatpush3.msra.mxu0 %v2394_v1  ;;  %v2416_v4 = vld [vmem:[%s2879_s3 + $0x10] sm:$0xff]  ;;  %v2423_v5 = vld [vmem:[%s2878_s2 + $0x8] sm:$0xff]  ;;  %2066 = vmatprep.mubr.msk.f32.mxu0 %vm2346_vm1, %v2345_v0  ;;  %s2349_s27 = smov 96  }
   0x3   :  { %2070 = vmatpush3.msra.mxu1 %v2405_v3  ;;  %2060 = vmatprep.subr.mxu0 %v2345_v0  ;;  %v2430_v6 = vld [vmem:[%s2879_s3 + $0x8] sm:$0xff]  ;;  %v2437_v7 = vld [vmem:[%s2878_s2] sm:$0xff] }
   0x4   :  { %2071 = vmatprep.subr.mxu1 %v2345_v0  ;;  %2061 = vmatpush3.msra.mxu0 %v2400_v2  ;;  %v2445_v8 = vld [vmem:[%s2879_s3] sm:$0xff]  ;;  %v1919_v21 = vld [vmem:[%s2883_s1 + $0xe] sm:$0x3] }
   0x5   :  { %2072 = vmatpush3.msra.mxu1 %v2416_v4  ;;  %2062 = vmatprep.subr.mxu0 %v2345_v0  ;;  %v2487_v11 = vld [vmem:[%s2880_s4] ss:$0 sm:$0xff]  ;;  %v1924_v63 = vld [vmem:[%s2882_s0 + $0x2] sm:$0x3] }
   0x6   :  { %2073 = vmatprep.subr.mxu1 %v2345_v0  ;;  %2063 = vmatpush3.msra.mxu0 %v2423_v5  ;;  %v2492_v13 = vld [vmem:[%s2881_s5] ss:$0 sm:$0xff] }
   0x7   :  { %2064 = vmatprep.subr.mxu0 %v2345_v0  ;;  %2074 = vmatpush3.msra.mxu1 %v2430_v6  ;;  %v78_v19 = vld [vmem:[%s2882_s0] sm:$0x3] }
   0x8   :  { %2065 = vmatpush3.msra.mxu0 %v2437_v7  ;;  %v2450_v9 = vld [vmem:[#allocation2] sm:$0x3]  ;;  %2075 = vmatprep.subr.mxu1 %v2345_v0  ;;  %v2453_v10 = vld [vmem:[#allocation3] sm:$0x3] }
   0x9   :  { %2067 = vmatmul.mubr.msk.f32.vlgmr.msra.gmra.mxu0 %vm86_vm2, %v2450_v9  ;;  %2076 = vmatpush3.msra.mxu1 %v2445_v8 }
   0xa   :  { %2077 = vmatprep.mubr.msk.f32.mxu1 %vm2346_vm1, %v2345_v0  ;;  %2080 = vmatprep.subr.mxu0 %v2345_v0 }
   0xb   :  { %2078 = vmatmul.mubr.msk.f32.vlgmr.msra.gmra.mxu1 %vm86_vm2, %v2453_v10  ;;  %2081 = vmatpush3.msra.mxu0 %v2394_v1 }
   0xc   :  { %2082 = vmatprep.subr.mxu0 %v2345_v0  ;;  %2091 = vmatprep.subr.mxu1 %v2345_v0 }
   0xd   :  { %2083 = vmatpush3.msra.mxu0 %v2400_v2  ;;  %2092 = vmatpush3.msra.mxu1 %v2405_v3 }
   0xe   :  { %2084 = vmatprep.subr.mxu0 %v2345_v0  ;;  %2093 = vmatprep.subr.mxu1 %v2345_v0 }
   0xf   :  { %2085 = vmatpush3.msra.mxu0 %v2423_v5  ;;  %2088 = vmatprep.mubr.msk.f32.mxu0 %vm2346_vm1, %v2345_v0 }
  0x10   :  { %2086 = vmatprep.subr.mxu0 %v2345_v0  ;;  %2094 = vmatpush3.msra.mxu1 %v2416_v4 }
  0x11   :  { %2087 = vmatpush3.msra.mxu0 %v2437_v7  ;;  %2095 = vmatprep.subr.mxu1 %v2345_v0 }
  0x12   :  { %2096 = vmatpush3.msra.mxu1 %v2430_v6  ;;  %2099 = vmatprep.mubr.msk.f32.mxu1 %vm2346_vm1, %v2345_v0 }
  0x13   :  { %2097 = vmatprep.subr.mxu1 %v2345_v0  ;;  %2102 = vmatprep.subr.mxu0 %v2345_v0 }
  0x14   :  { %2098 = vmatpush3.msra.mxu1 %v2445_v8 }
  0x15   :  { %2113 = vmatprep.subr.mxu1 %v2345_v0 }
  0xc9   :  { %v156_v12 = vpop.f32.mrf.mxu0 }
  0xca   :  { %v157_v14 = vadd.f32 %v2487_v11, %v156_v12 }
  0xcb   :  { %v2068_v15 = vpop.f32.mrf.mxu0  ;;  %v267_v16 = vpop.f32.mrf.mxu1 }
  0xcc   :  { %v268_v17 = vadd.f32 %v2492_v13, %v267_v16  ;;  %168 = vrot.lane.b32.xlu0 %v157_v14, %s2347_s21  ;;  %v160_v20 = vadd.f32 %v157_v14, %v78_v19 }
  0xcd   :  { %v2079_v18 = vpop.f32.mrf.mxu1 }
  0xce   :  { %v1918_v22 = vmul.f32 -1.442695, %v160_v20  ;;  %v271_v23 = vadd.f32 %v1919_v21, %v268_v17 }
  0xd0   :  { %279 = vrot.lane.b32.xlu0 %v268_v17, %s2347_s21  ;;  %2239 = vpow2.f32 %v1918_v22  ;;  %v1922_v24 = vmul.f32 -1.442695, %v271_v23 }
  0xd2   :  { %2241 = vpow2.f32 %v1922_v24 }
  0xdd   :  { %v2240_v25 = vpop.eup %2239 }
  0xde   :  { %v164_v26 = vadd.f32 1.0, %v2240_v25 }
  0xdf   :  { %v2242_v27 = vpop.eup %2241 }
  0xe0   :  { %2243 = vrcp.f32 %v164_v26  ;;  %v275_v28 = vadd.f32 1.0, %v2242_v27 }
  0xe2   :  { %2245 = vrcp.f32 %v275_v28 }
  0xed   :  { %v2244_v29 = vpop.eup %2243 }
  0xee   :  { %v178_v42 = vsub.f32 1.0, %v2244_v29 }
  0xef   :  { %v2246_v32 = vpop.eup %2245 }
  0xf0   :  { %v289_v48 = vsub.f32 1.0, %v2246_v32 }
 0x13e   :  { %v169_v30 = vpop.permute.xlu0 %168 }
 0x13f   :  { %v171_v31 = vmul.f32 %v2244_v29, %v169_v30 }
 0x141   :  { %173 = vrot.lane.b32.xlu1 %v171_v31, %s2347_s21 }
 0x142   :  { %v280_v33 = vpop.permute.xlu0 %279 }
 0x143   :  { %v282_v34 = vmul.f32 %v2246_v32, %v280_v33 }
 0x145   :  { %284 = vrot.lane.b32.xlu1 %v282_v34, %s2347_s21 }
 0x149   :  { %184 = vrot.lane.b32.xlu1 %v2450_v9, %s2348_s26 }
 0x14d   :  { %295 = vrot.lane.b32.xlu1 %v2453_v10, %s2348_s26  ;;  %v1927_v10 = vld [vmem:[%s2883_s1 + $0xc] sm:$0x3] }
 0x1b3   :  { %v174_v35 = vpop.permute.xlu1 %173 }
 0x1b4   :  { %v176_v36 = vadd.f32 %v174_v35, %v78_v19 }
 0x1b6   :  { %2247 = vtanh.f32 %v176_v36 }
 0x1b7   :  { %v285_v37 = vpop.permute.xlu1 %284 }
 0x1b8   :  { %v287_v38 = vadd.f32 %v1919_v21, %v285_v37 }
 0x1ba   :  { %2249 = vtanh.f32 %v287_v38 }
 0x1bb   :  { %v185_v41 = vpop.permute.xlu1 %184 }
 0x1bc   :  { %v187_v44 = vmul.f32 %v2244_v29, %v185_v41 }
 0x1bf   :  { %v296_v46 = vpop.permute.xlu1 %295 }
 0x1c0   :  { %v298_v50 = vmul.f32 %v2246_v32, %v296_v46 }
 0x1c3   :  { %v2248_v39 = vpop.eup %2247 }
 0x1c4   :  { %180 = vrot.lane.b32.xlu0 %v2248_v39, %s2349_s27 }
 0x1c7   :  { %v2250_v40 = vpop.eup %2249 }
 0x1c8   :  { %291 = vrot.lane.b32.xlu0 %v2250_v40, %s2349_s27 }
 0x236   :  { %v181_v43 = vpop.permute.xlu0 %180 }
 0x237   :  { %v183_v45 = vmul.f32 %v181_v43, %v178_v42 }
 0x239   :  { %v188_v47 = vadd.f32 %v187_v44, %v183_v45 }
 0x23a   :  { %v292_v49 = vpop.permute.xlu0 %291 }
 0x23b   :  { %v294_v51 = vmul.f32 %v292_v49, %v289_v48  ;;  %301 = vrot.lane.b32.xlu0 %v188_v47, %s2349_s27 }
 0x23d   :  { %v299_v52 = vadd.f32 %v298_v50, %v294_v51 }
 0x23f   :  { %307 = vrot.lane.b32.xlu1 %v299_v52, %s2349_s27 }
 0x2ad   :  { %v302_v53 = vpop.permute.xlu0 %301 }
 0x2ae   :  { %305 = vst.msk [vmem:[#allocation2] sm:$0x3] %vm65_vm0, %v302_v53  ;;  %311 = vst.msk [vmem:[%s2884_s6] sm:$0x3] %vm65_vm0, %v302_v53 }
 0x2b1   :  { %v308_v54 = vpop.permute.xlu1 %307 }
 0x2b2   :  { %310 = vst.msk [vmem:[#allocation3] sm:$0x3] %vm65_vm0, %v308_v54  ;;  %1923 = vst.msk [vmem:[%s2885_s7 + $0xe] sm:$0x3] %vm65_vm0, %v308_v54  ;;  %v1932_v54 = vld [vmem:[%s2882_s0 + $0x4] sm:$0x3] }
 0x2b5   :  { %v316_v55 = vld [vmem:[#allocation2] sm:$0x3] }
 0x2b6   :  { %2089 = vmatmul.mubr.msk.f32.vlgmr.msra.gmra.mxu0 %vm86_vm2, %v316_v55 }
 0x2b7   :  { %2103 = vmatpush3.msra.mxu0 %v2394_v1  ;;  %2110 = vmatprep.mubr.msk.f32.mxu0 %vm2346_vm1, %v2345_v0 }
 0x2b8   :  { %2104 = vmatprep.subr.mxu0 %v2345_v0 }
 0x2b9   :  { %v421_v56 = vld [vmem:[#allocation3] sm:$0x3]  ;;  %2105 = vmatpush3.msra.mxu0 %v2400_v2 }
 0x2ba   :  { %2100 = vmatmul.mubr.msk.f32.vlgmr.msra.gmra.mxu1 %vm86_vm2, %v421_v56  ;;  %2106 = vmatprep.subr.mxu0 %v2345_v0 }
 0x2bb   :  { %2107 = vmatpush3.msra.mxu0 %v2423_v5  ;;  %2114 = vmatpush3.msra.mxu1 %v2405_v3 }
 0x2bc   :  { %2108 = vmatprep.subr.mxu0 %v2345_v0  ;;  %2115 = vmatprep.subr.mxu1 %v2345_v0 }
 0x2bd   :  { %2109 = vmatpush3.msra.mxu0 %v2437_v7  ;;  %2116 = vmatpush3.msra.mxu1 %v2416_v4 }
 0x2be   :  { %2117 = vmatprep.subr.mxu1 %v2345_v0  ;;  %2121 = vmatprep.mubr.msk.f32.mxu1 %vm2346_vm1, %v2345_v0 }
 0x2bf   :  { %2118 = vmatpush3.msra.mxu1 %v2430_v6  ;;  %2124 = vmatprep.subr.mxu0 %v2345_v0 }
 0x2c0   :  { %2119 = vmatprep.subr.mxu1 %v2345_v0 }
 0x2c1   :  { %2120 = vmatpush3.msra.mxu1 %v2445_v8 }
 0x2c2   :  { %2135 = vmatprep.subr.mxu1 %v2345_v0 }
 0x376   :  { %v386_v57 = vpop.f32.mrf.mxu0 }
 0x377   :  { %v387_v58 = vadd.f32 %v2487_v11, %v386_v57 }
 0x378   :  { %v2090_v59 = vpop.f32.mrf.mxu0 }
 0x379   :  { %398 = vrot.lane.b32.xlu0 %v387_v58, %s2347_s21  ;;  %v390_v9 = vadd.f32 %v1924_v63, %v387_v58 }
 0x37a   :  { %v491_v60 = vpop.f32.mrf.mxu1 }
 0x37b   :  { %v492_v61 = vadd.f32 %v2492_v13, %v491_v60  ;;  %v1926_v12 = vmul.f32 -1.442695, %v390_v9 }
 0x37c   :  { %v2101_v62 = vpop.f32.mrf.mxu1 }
 0x37d   :  { %503 = vrot.lane.b32.xlu1 %v492_v61, %s2347_s21  ;;  %v495_v14 = vadd.f32 %v1927_v10, %v492_v61  ;;  %2251 = vpow2.f32 %v1926_v12 }
 0x37f   :  { %v1929_v15 = vmul.f32 -1.442695, %v495_v14 }
 0x381   :  { %2253 = vpow2.f32 %v1929_v15 }
 0x38a   :  { %v2252_v16 = vpop.eup %2251 }
 0x38b   :  { %v394_v17 = vadd.f32 1.0, %v2252_v16 }
 0x38d   :  { %2255 = vrcp.f32 %v394_v17 }
 0x38e   :  { %v2254_v18 = vpop.eup %2253 }
 0x38f   :  { %v499_v19 = vadd.f32 1.0, %v2254_v18 }
 0x391   :  { %2257 = vrcp.f32 %v499_v19 }
 0x39a   :  { %v2256_v20 = vpop.eup %2255 }
 0x39b   :  { %v408_v33 = vsub.f32 1.0, %v2256_v20 }
 0x39e   :  { %v2258_v23 = vpop.eup %2257 }
 0x39f   :  { %v513_v39 = vsub.f32 1.0, %v2258_v23 }
 0x3eb   :  { %v399_v21 = vpop.permute.xlu0 %398 }
 0x3ec   :  { %v401_v22 = vmul.f32 %v2256_v20, %v399_v21 }
 0x3ee   :  { %403 = vrot.lane.b32.xlu0 %v401_v22, %s2347_s21 }
 0x3ef   :  { %v504_v24 = vpop.permute.xlu1 %503 }
 0x3f0   :  { %v506_v25 = vmul.f32 %v2258_v23, %v504_v24 }
 0x3f2   :  { %508 = vrot.lane.b32.xlu1 %v506_v25, %s2347_s21 }
 0x3f6   :  { %414 = vrot.lane.b32.xlu1 %v316_v55, %s2348_s26 }
 0x3fa   :  { %519 = vrot.lane.b32.xlu1 %v421_v56, %s2348_s26  ;;  %v1935_v56 = vld [vmem:[%s2883_s1 + $0xa] sm:$0x3] }
 0x460   :  { %v404_v26 = vpop.permute.xlu0 %403 }
 0x461   :  { %v406_v27 = vadd.f32 %v1924_v63, %v404_v26 }
 0x463   :  { %2259 = vtanh.f32 %v406_v27 }
 0x464   :  { %v509_v28 = vpop.permute.xlu1 %508 }
 0x465   :  { %v511_v29 = vadd.f32 %v1927_v10, %v509_v28 }
 0x467   :  { %2261 = vtanh.f32 %v511_v29 }
 0x468   :  { %v415_v32 = vpop.permute.xlu1 %414 }
 0x469   :  { %v417_v35 = vmul.f32 %v2256_v20, %v415_v32 }
 0x46c   :  { %v520_v37 = vpop.permute.xlu1 %519 }
 0x46d   :  { %v522_v41 = vmul.f32 %v2258_v23, %v520_v37 }
 0x470   :  { %v2260_v30 = vpop.eup %2259 }
 0x471   :  { %410 = vrot.lane.b32.xlu0 %v2260_v30, %s2349_s27 }
 0x474   :  { %v2262_v31 = vpop.eup %2261 }
 0x475   :  { %515 = vrot.lane.b32.xlu0 %v2262_v31, %s2349_s27 }
 0x4e3   :  { %v411_v34 = vpop.permute.xlu0 %410 }
 0x4e4   :  { %v413_v36 = vmul.f32 %v411_v34, %v408_v33 }
 0x4e6   :  { %v418_v38 = vadd.f32 %v417_v35, %v413_v36 }
 0x4e7   :  { %v516_v40 = vpop.permute.xlu0 %515 }
 0x4e8   :  { %v518_v42 = vmul.f32 %v516_v40, %v513_v39  ;;  %525 = vrot.lane.b32.xlu0 %v418_v38, %s2349_s27 }
 0x4ea   :  { %v523_v43 = vadd.f32 %v522_v41, %v518_v42 }
 0x4ec   :  { %530 = vrot.lane.b32.xlu1 %v523_v43, %s2349_s27 }
 0x55a   :  { %v526_v44 = vpop.permute.xlu0 %525 }
 0x55b   :  { %528 = vst.msk [vmem:[#allocation2] sm:$0x3] %vm65_vm0, %v526_v44  ;;  %1930 = vst.msk [vmem:[%s2884_s6 + $0x2] sm:$0x3] %vm65_vm0, %v526_v44 }
 0x55e   :  { %v531_v45 = vpop.permute.xlu1 %530 }
 0x55f   :  { %533 = vst.msk [vmem:[#allocation3] sm:$0x3] %vm65_vm0, %v531_v45  ;;  %1931 = vst.msk [vmem:[%s2885_s7 + $0xc] sm:$0x3] %vm65_vm0, %v531_v45  ;;  %v1940_v45 = vld [vmem:[%s2882_s0 + $0x6] sm:$0x3] }
 0x562   :  { %v540_v46 = vld [vmem:[#allocation2] sm:$0x3] }
 0x563   :  { %2111 = vmatmul.mubr.msk.f32.vlgmr.msra.gmra.mxu0 %vm86_vm2, %v540_v46 }
 0x564   :  { %2125 = vmatpush3.msra.mxu0 %v2394_v1  ;;  %2132 = vmatprep.mubr.msk.f32.mxu0 %vm2346_vm1, %v2345_v0 }
 0x565   :  { %2126 = vmatprep.subr.mxu0 %v2345_v0 }
 0x566   :  { %v645_v47 = vld [vmem:[#allocation3] sm:$0x3]  ;;  %2127 = vmatpush3.msra.mxu0 %v2400_v2 }
 0x567   :  { %2122 = vmatmul.mubr.msk.f32.vlgmr.msra.gmra.mxu1 %vm86_vm2, %v645_v47  ;;  %2128 = vmatprep.subr.mxu0 %v2345_v0 }
 0x568   :  { %2129 = vmatpush3.msra.mxu0 %v2423_v5  ;;  %2136 = vmatpush3.msra.mxu1 %v2405_v3 }
 0x569   :  { %2130 = vmatprep.subr.mxu0 %v2345_v0  ;;  %2137 = vmatprep.subr.mxu1 %v2345_v0 }
 0x56a   :  { %2131 = vmatpush3.msra.mxu0 %v2437_v7  ;;  %2138 = vmatpush3.msra.mxu1 %v2416_v4 }
 0x56b   :  { %2139 = vmatprep.subr.mxu1 %v2345_v0  ;;  %2143 = vmatprep.mubr.msk.f32.mxu1 %vm2346_vm1, %v2345_v0 }
 0x56c   :  { %2140 = vmatpush3.msra.mxu1 %v2430_v6  ;;  %2146 = vmatprep.subr.mxu0 %v2345_v0 }
 0x56d   :  { %2141 = vmatprep.subr.mxu1 %v2345_v0 }
 0x56e   :  { %2142 = vmatpush3.msra.mxu1 %v2445_v8 }
 0x56f   :  { %2157 = vmatprep.subr.mxu1 %v2345_v0 }
 0x623   :  { %v610_v48 = vpop.f32.mrf.mxu0 }
 0x624   :  { %v611_v49 = vadd.f32 %v2487_v11, %v610_v48 }
 0x625   :  { %v2112_v50 = vpop.f32.mrf.mxu0 }
 0x626   :  { %622 = vrot.lane.b32.xlu0 %v611_v49, %s2347_s21  ;;  %v614_v55 = vadd.f32 %v1932_v54, %v611_v49 }
 0x627   :  { %v715_v51 = vpop.f32.mrf.mxu1 }
 0x628   :  { %v716_v52 = vadd.f32 %v2492_v13, %v715_v51  ;;  %v1934_v57 = vmul.f32 -1.442695, %v614_v55 }
 0x629   :  { %v2123_v53 = vpop.f32.mrf.mxu1 }
 0x62a   :  { %727 = vrot.lane.b32.xlu1 %v716_v52, %s2347_s21  ;;  %v719_v58 = vadd.f32 %v1935_v56, %v716_v52  ;;  %2263 = vpow2.f32 %v1934_v57 }
 0x62c   :  { %v1937_v59 = vmul.f32 -1.442695, %v719_v58 }
 0x62e   :  { %2265 = vpow2.f32 %v1937_v59 }
 0x637   :  { %v2264_v60 = vpop.eup %2263 }
 0x638   :  { %v618_v61 = vadd.f32 1.0, %v2264_v60 }
 0x63a   :  { %2267 = vrcp.f32 %v618_v61 }
 0x63b   :  { %v2266_v62 = vpop.eup %2265 }
 0x63c   :  { %v723_v63 = vadd.f32 1.0, %v2266_v62 }
 0x63e   :  { %2269 = vrcp.f32 %v723_v63 }
 0x647   :  { %v2268_v9 = vpop.eup %2267 }
 0x648   :  { %v632_v24 = vsub.f32 1.0, %v2268_v9 }
 0x64b   :  { %v2270_v14 = vpop.eup %2269 }
 0x64c   :  { %v737_v30 = vsub.f32 1.0, %v2270_v14 }
 0x698   :  { %v623_v10 = vpop.permute.xlu0 %622 }
 0x699   :  { %v625_v12 = vmul.f32 %v2268_v9, %v623_v10 }
 0x69b   :  { %627 = vrot.lane.b32.xlu0 %v625_v12, %s2347_s21 }
 0x69c   :  { %v728_v15 = vpop.permute.xlu1 %727 }
 0x69d   :  { %v730_v16 = vmul.f32 %v2270_v14, %v728_v15 }
 0x69f   :  { %732 = vrot.lane.b32.xlu1 %v730_v16, %s2347_s21 }
 0x6a3   :  { %638 = vrot.lane.b32.xlu1 %v540_v46, %s2348_s26 }
 0x6a7   :  { %743 = vrot.lane.b32.xlu1 %v645_v47, %s2348_s26  ;;  %v1943_v47 = vld [vmem:[%s2883_s1 + $0x8] sm:$0x3] }
 0x70d   :  { %v628_v17 = vpop.permute.xlu0 %627 }
 0x70e   :  { %v630_v18 = vadd.f32 %v1932_v54, %v628_v17 }
 0x710   :  { %2271 = vtanh.f32 %v630_v18 }
 0x711   :  { %v733_v19 = vpop.permute.xlu1 %732 }
 0x712   :  { %v735_v20 = vadd.f32 %v1935_v56, %v733_v19 }
 0x714   :  { %2273 = vtanh.f32 %v735_v20 }
 0x715   :  { %v639_v23 = vpop.permute.xlu1 %638 }
 0x716   :  { %v641_v26 = vmul.f32 %v2268_v9, %v639_v23 }
 0x719   :  { %v744_v28 = vpop.permute.xlu1 %743 }
 0x71a   :  { %v746_v32 = vmul.f32 %v2270_v14, %v744_v28 }
 0x71d   :  { %v2272_v21 = vpop.eup %2271 }
 0x71e   :  { %634 = vrot.lane.b32.xlu0 %v2272_v21, %s2349_s27 }
 0x721   :  { %v2274_v22 = vpop.eup %2273 }
 0x722   :  { %739 = vrot.lane.b32.xlu0 %v2274_v22, %s2349_s27 }
 0x790   :  { %v635_v25 = vpop.permute.xlu0 %634 }
 0x791   :  { %v637_v27 = vmul.f32 %v635_v25, %v632_v24 }
 0x793   :  { %v642_v29 = vadd.f32 %v641_v26, %v637_v27 }
 0x794   :  { %v740_v31 = vpop.permute.xlu0 %739 }
 0x795   :  { %v742_v33 = vmul.f32 %v740_v31, %v737_v30  ;;  %749 = vrot.lane.b32.xlu0 %v642_v29, %s2349_s27 }
 0x797   :  { %v747_v34 = vadd.f32 %v746_v32, %v742_v33 }
 0x799   :  { %754 = vrot.lane.b32.xlu1 %v747_v34, %s2349_s27 }
 0x807   :  { %v750_v35 = vpop.permute.xlu0 %749 }
 0x808   :  { %752 = vst.msk [vmem:[#allocation2] sm:$0x3] %vm65_vm0, %v750_v35  ;;  %1938 = vst.msk [vmem:[%s2884_s6 + $0x4] sm:$0x3] %vm65_vm0, %v750_v35 }
 0x80b   :  { %v755_v36 = vpop.permute.xlu1 %754 }
 0x80c   :  { %757 = vst.msk [vmem:[#allocation3] sm:$0x3] %vm65_vm0, %v755_v36  ;;  %1939 = vst.msk [vmem:[%s2885_s7 + $0xa] sm:$0x3] %vm65_vm0, %v755_v36  ;;  %v1948_v36 = vld [vmem:[%s2882_s0 + $0x8] sm:$0x3] }
 0x80f   :  { %v764_v37 = vld [vmem:[#allocation2] sm:$0x3] }
 0x810   :  { %2133 = vmatmul.mubr.msk.f32.vlgmr.msra.gmra.mxu0 %vm86_vm2, %v764_v37 }
 0x811   :  { %2147 = vmatpush3.msra.mxu0 %v2394_v1  ;;  %2154 = vmatprep.mubr.msk.f32.mxu0 %vm2346_vm1, %v2345_v0 }
 0x812   :  { %2148 = vmatprep.subr.mxu0 %v2345_v0 }
 0x813   :  { %v869_v38 = vld [vmem:[#allocation3] sm:$0x3]  ;;  %2149 = vmatpush3.msra.mxu0 %v2400_v2 }
 0x814   :  { %2144 = vmatmul.mubr.msk.f32.vlgmr.msra.gmra.mxu1 %vm86_vm2, %v869_v38  ;;  %2150 = vmatprep.subr.mxu0 %v2345_v0 }
 0x815   :  { %2151 = vmatpush3.msra.mxu0 %v2423_v5  ;;  %2158 = vmatpush3.msra.mxu1 %v2405_v3 }
 0x816   :  { %2152 = vmatprep.subr.mxu0 %v2345_v0  ;;  %2159 = vmatprep.subr.mxu1 %v2345_v0 }
 0x817   :  { %2153 = vmatpush3.msra.mxu0 %v2437_v7  ;;  %2160 = vmatpush3.msra.mxu1 %v2416_v4 }
 0x818   :  { %2161 = vmatprep.subr.mxu1 %v2345_v0  ;;  %2165 = vmatprep.mubr.msk.f32.mxu1 %vm2346_vm1, %v2345_v0 }
 0x819   :  { %2162 = vmatpush3.msra.mxu1 %v2430_v6  ;;  %2168 = vmatprep.subr.mxu0 %v2345_v0 }
 0x81a   :  { %2163 = vmatprep.subr.mxu1 %v2345_v0 }
 0x81b   :  { %2164 = vmatpush3.msra.mxu1 %v2445_v8 }
 0x81c   :  { %2179 = vmatprep.subr.mxu1 %v2345_v0 }
 0x8d0   :  { %v834_v39 = vpop.f32.mrf.mxu0 }
 0x8d1   :  { %v835_v40 = vadd.f32 %v2487_v11, %v834_v39 }
 0x8d2   :  { %v2134_v41 = vpop.f32.mrf.mxu0 }
 0x8d3   :  { %846 = vrot.lane.b32.xlu0 %v835_v40, %s2347_s21  ;;  %v838_v46 = vadd.f32 %v1940_v45, %v835_v40 }
 0x8d4   :  { %v939_v42 = vpop.f32.mrf.mxu1 }
 0x8d5   :  { %v940_v43 = vadd.f32 %v2492_v13, %v939_v42  ;;  %v1942_v48 = vmul.f32 -1.442695, %v838_v46 }
 0x8d6   :  { %v2145_v44 = vpop.f32.mrf.mxu1 }
 0x8d7   :  { %951 = vrot.lane.b32.xlu1 %v940_v43, %s2347_s21  ;;  %v943_v49 = vadd.f32 %v1943_v47, %v940_v43  ;;  %2275 = vpow2.f32 %v1942_v48 }
 0x8d9   :  { %v1945_v50 = vmul.f32 -1.442695, %v943_v49 }
 0x8db   :  { %2277 = vpow2.f32 %v1945_v50 }
 0x8e4   :  { %v2276_v51 = vpop.eup %2275 }
 0x8e5   :  { %v842_v52 = vadd.f32 1.0, %v2276_v51 }
 0x8e7   :  { %2279 = vrcp.f32 %v842_v52 }
 0x8e8   :  { %v2278_v53 = vpop.eup %2277 }
 0x8e9   :  { %v947_v54 = vadd.f32 1.0, %v2278_v53 }
 0x8eb   :  { %2281 = vrcp.f32 %v947_v54 }
 0x8f4   :  { %v2280_v55 = vpop.eup %2279 }
 0x8f5   :  { %v856_v15 = vsub.f32 1.0, %v2280_v55 }
 0x8f8   :  { %v2282_v58 = vpop.eup %2281 }
 0x8f9   :  { %v961_v21 = vsub.f32 1.0, %v2282_v58 }
 0x945   :  { %v847_v56 = vpop.permute.xlu0 %846 }
 0x946   :  { %v849_v57 = vmul.f32 %v2280_v55, %v847_v56 }
 0x948   :  { %851 = vrot.lane.b32.xlu0 %v849_v57, %s2347_s21 }
 0x949   :  { %v952_v59 = vpop.permute.xlu1 %951 }
 0x94a   :  { %v954_v60 = vmul.f32 %v2282_v58, %v952_v59 }
 0x94c   :  { %956 = vrot.lane.b32.xlu1 %v954_v60, %s2347_s21 }
 0x950   :  { %862 = vrot.lane.b32.xlu1 %v764_v37, %s2348_s26 }
 0x954   :  { %967 = vrot.lane.b32.xlu1 %v869_v38, %s2348_s26  ;;  %v1951_v38 = vld [vmem:[%s2883_s1 + $0x6] sm:$0x3] }
 0x9ba   :  { %v852_v61 = vpop.permute.xlu0 %851 }
 0x9bb   :  { %v854_v62 = vadd.f32 %v1940_v45, %v852_v61 }
 0x9bd   :  { %2283 = vtanh.f32 %v854_v62 }
 0x9be   :  { %v957_v63 = vpop.permute.xlu1 %956 }
 0x9bf   :  { %v959_v9 = vadd.f32 %v1943_v47, %v957_v63 }
 0x9c1   :  { %2285 = vtanh.f32 %v959_v9 }
 0x9c2   :  { %v863_v14 = vpop.permute.xlu1 %862 }
 0x9c3   :  { %v865_v17 = vmul.f32 %v2280_v55, %v863_v14 }
 0x9c6   :  { %v968_v19 = vpop.permute.xlu1 %967 }
 0x9c7   :  { %v970_v23 = vmul.f32 %v2282_v58, %v968_v19 }
 0x9ca   :  { %v2284_v10 = vpop.eup %2283 }
 0x9cb   :  { %858 = vrot.lane.b32.xlu0 %v2284_v10, %s2349_s27 }
 0x9ce   :  { %v2286_v12 = vpop.eup %2285 }
 0x9cf   :  { %963 = vrot.lane.b32.xlu0 %v2286_v12, %s2349_s27 }
 0xa3d   :  { %v859_v16 = vpop.permute.xlu0 %858 }
 0xa3e   :  { %v861_v18 = vmul.f32 %v859_v16, %v856_v15 }
 0xa40   :  { %v866_v20 = vadd.f32 %v865_v17, %v861_v18 }
 0xa41   :  { %v964_v22 = vpop.permute.xlu0 %963 }
 0xa42   :  { %v966_v24 = vmul.f32 %v964_v22, %v961_v21  ;;  %973 = vrot.lane.b32.xlu0 %v866_v20, %s2349_s27 }
 0xa44   :  { %v971_v25 = vadd.f32 %v970_v23, %v966_v24 }
 0xa46   :  { %978 = vrot.lane.b32.xlu1 %v971_v25, %s2349_s27 }
 0xab4   :  { %v974_v26 = vpop.permute.xlu0 %973 }
 0xab5   :  { %976 = vst.msk [vmem:[#allocation2] sm:$0x3] %vm65_vm0, %v974_v26  ;;  %1946 = vst.msk [vmem:[%s2884_s6 + $0x6] sm:$0x3] %vm65_vm0, %v974_v26 }
 0xab8   :  { %v979_v27 = vpop.permute.xlu1 %978 }
 0xab9   :  { %981 = vst.msk [vmem:[#allocation3] sm:$0x3] %vm65_vm0, %v979_v27  ;;  %1947 = vst.msk [vmem:[%s2885_s7 + $0x8] sm:$0x3] %vm65_vm0, %v979_v27 }
 0xabc   :  { %v988_v28 = vld [vmem:[#allocation2] sm:$0x3] }
 0xabd   :  { %2155 = vmatmul.mubr.msk.f32.vlgmr.msra.gmra.mxu0 %vm86_vm2, %v988_v28 }
 0xabe   :  { %2169 = vmatpush3.msra.mxu0 %v2394_v1  ;;  %2176 = vmatprep.mubr.msk.f32.mxu0 %vm2346_vm1, %v2345_v0 }
 0xabf   :  { %2170 = vmatprep.subr.mxu0 %v2345_v0 }
 0xac0   :  { %v1093_v29 = vld [vmem:[#allocation3] sm:$0x3]  ;;  %2171 = vmatpush3.msra.mxu0 %v2400_v2 }
 0xac1   :  { %2166 = vmatmul.mubr.msk.f32.vlgmr.msra.gmra.mxu1 %vm86_vm2, %v1093_v29  ;;  %2172 = vmatprep.subr.mxu0 %v2345_v0 }
 0xac2   :  { %2173 = vmatpush3.msra.mxu0 %v2423_v5  ;;  %2180 = vmatpush3.msra.mxu1 %v2405_v3 }
 0xac3   :  { %2174 = vmatprep.subr.mxu0 %v2345_v0  ;;  %2181 = vmatprep.subr.mxu1 %v2345_v0 }
 0xac4   :  { %2175 = vmatpush3.msra.mxu0 %v2437_v7  ;;  %2182 = vmatpush3.msra.mxu1 %v2416_v4 }
 0xac5   :  { %2183 = vmatprep.subr.mxu1 %v2345_v0  ;;  %2187 = vmatprep.mubr.msk.f32.mxu1 %vm2346_vm1, %v2345_v0 }
 0xac6   :  { %2184 = vmatpush3.msra.mxu1 %v2430_v6  ;;  %2190 = vmatprep.subr.mxu0 %v2345_v0 }
 0xac7   :  { %2185 = vmatprep.subr.mxu1 %v2345_v0 }
 0xac8   :  { %2186 = vmatpush3.msra.mxu1 %v2445_v8 }
 0xac9   :  { %2201 = vmatprep.subr.mxu1 %v2345_v0 }
 0xb7d   :  { %v1058_v30 = vpop.f32.mrf.mxu0 }
 0xb7e   :  { %v1059_v31 = vadd.f32 %v2487_v11, %v1058_v30 }
 0xb7f   :  { %v2156_v32 = vpop.f32.mrf.mxu0 }
 0xb80   :  { %1070 = vrot.lane.b32.xlu0 %v1059_v31, %s2347_s21  ;;  %v1062_v37 = vadd.f32 %v1948_v36, %v1059_v31 }
 0xb81   :  { %v1163_v33 = vpop.f32.mrf.mxu1 }
 0xb82   :  { %v1164_v34 = vadd.f32 %v2492_v13, %v1163_v33  ;;  %v1950_v39 = vmul.f32 -1.442695, %v1062_v37 }
 0xb83   :  { %v2167_v35 = vpop.f32.mrf.mxu1 }
 0xb84   :  { %1175 = vrot.lane.b32.xlu1 %v1164_v34, %s2347_s21  ;;  %v1167_v40 = vadd.f32 %v1951_v38, %v1164_v34  ;;  %2287 = vpow2.f32 %v1950_v39 }
 0xb86   :  { %v1953_v41 = vmul.f32 -1.442695, %v1167_v40 }
 0xb88   :  { %2289 = vpow2.f32 %v1953_v41 }
 0xb91   :  { %v2288_v42 = vpop.eup %2287 }
 0xb92   :  { %v1066_v43 = vadd.f32 1.0, %v2288_v42 }
 0xb94   :  { %2291 = vrcp.f32 %v1066_v43 }
 0xb95   :  { %v2290_v44 = vpop.eup %2289 }
 0xb96   :  { %v1171_v45 = vadd.f32 1.0, %v2290_v44 }
 0xb98   :  { %2293 = vrcp.f32 %v1171_v45 }
 0xba1   :  { %v2292_v46 = vpop.eup %2291 }
 0xba2   :  { %v1080_v59 = vsub.f32 1.0, %v2292_v46 }
 0xba5   :  { %v2294_v49 = vpop.eup %2293 }
 0xba6   :  { %v1185_v10 = vsub.f32 1.0, %v2294_v49 }
 0xbf2   :  { %v1071_v47 = vpop.permute.xlu0 %1070 }
 0xbf3   :  { %v1073_v48 = vmul.f32 %v2292_v46, %v1071_v47 }
 0xbf5   :  { %1075 = vrot.lane.b32.xlu0 %v1073_v48, %s2347_s21 }
 0xbf6   :  { %v1176_v50 = vpop.permute.xlu1 %1175 }
 0xbf7   :  { %v1178_v51 = vmul.f32 %v2294_v49, %v1176_v50 }
 0xbf9   :  { %1180 = vrot.lane.b32.xlu1 %v1178_v51, %s2347_s21 }
 0xbfd   :  { %1086 = vrot.lane.b32.xlu1 %v988_v28, %s2348_s26 }
 0xc01   :  { %1191 = vrot.lane.b32.xlu1 %v1093_v29, %s2348_s26 }
 0xc67   :  { %v1076_v52 = vpop.permute.xlu0 %1075 }
 0xc68   :  { %v1078_v53 = vadd.f32 %v1948_v36, %v1076_v52 }
 0xc6a   :  { %2295 = vtanh.f32 %v1078_v53 }
 0xc6b   :  { %v1181_v54 = vpop.permute.xlu1 %1180 }
 0xc6c   :  { %v1183_v55 = vadd.f32 %v1951_v38, %v1181_v54  ;;  %v2335_v54 = vld [vmem:[%s2878_s2 + $0x18] sm:$0xff] }
 0xc6e   :  { %2297 = vtanh.f32 %v1183_v55 }
 0xc6f   :  { %v1087_v58 = vpop.permute.xlu1 %1086 }
 0xc70   :  { %v1089_v61 = vmul.f32 %v2292_v46, %v1087_v58  ;;  %v2338_v58 = vld [vmem:[%s2879_s3 + $0x18] sm:$0xff] }
 0xc73   :  { %v1192_v63 = vpop.permute.xlu1 %1191 }
 0xc74   :  { %v1194_v14 = vmul.f32 %v2294_v49, %v1192_v63 }
 0xc77   :  { %v2296_v56 = vpop.eup %2295 }
 0xc78   :  { %1082 = vrot.lane.b32.xlu0 %v2296_v56, %s2349_s27  ;;  %v2336_v56 = vld [vmem:[%s2878_s2 + $0x10] sm:$0xff] }
 0xc7b   :  { %v2298_v57 = vpop.eup %2297 }
 0xc7c   :  { %1187 = vrot.lane.b32.xlu0 %v2298_v57, %s2349_s27  ;;  %v2337_v57 = vld [vmem:[%s2878_s2 + $0x8] sm:$0xff] }
 0xcea   :  { %v1083_v60 = vpop.permute.xlu0 %1082 }
 0xceb   :  { %v1085_v62 = vmul.f32 %v1083_v60, %v1080_v59  ;;  %v2339_v59 = vld [vmem:[%s2878_s2] sm:$0xff]  ;;  %v2340_v60 = vld [vmem:[%s2879_s3 + $0x10] sm:$0xff] }
 0xced   :  { %v1090_v9 = vadd.f32 %v1089_v61, %v1085_v62  ;;  %v2341_v61 = vld [vmem:[%s2879_s3 + $0x8] sm:$0xff]  ;;  %v2342_v62 = vld [vmem:[%s2879_s3] sm:$0xff] }
 0xcee   :  { %v1188_v12 = vpop.permute.xlu0 %1187 }
 0xcef   :  { %v1190_v15 = vmul.f32 %v1188_v12, %v1185_v10  ;;  %1197 = vrot.lane.b32.xlu0 %v1090_v9, %s2349_s27  ;;  %v2813_v9 = vld [vmem:[%s2880_s4] ss:$0 sm:$0xff] }
 0xcf1   :  { %v1195_v16 = vadd.f32 %v1194_v14, %v1190_v15 }
 0xcf3   :  { %1202 = vrot.lane.b32.xlu1 %v1195_v16, %s2349_s27 }
 0xd61   :  { %v1198_v17 = vpop.permute.xlu0 %1197 }
 0xd62   :  { %1200 = vst.msk [vmem:[#allocation2] sm:$0x3] %vm65_vm0, %v1198_v17  ;;  %1954 = vst.msk [vmem:[%s2884_s6 + $0x8] sm:$0x3] %vm65_vm0, %v1198_v17  ;;  %v1964_v17 = vld [vmem:[%s2882_s0 + $0xc] sm:$0x3] }
 0xd65   :  { %v1203_v18 = vpop.permute.xlu1 %1202 }
 0xd66   :  { %1205 = vst.msk [vmem:[#allocation3] sm:$0x3] %vm65_vm0, %v1203_v18  ;;  %1955 = vst.msk [vmem:[%s2885_s7 + $0x6] sm:$0x3] %vm65_vm0, %v1203_v18 }
 0xd69   :  { %v1212_v19 = vld [vmem:[#allocation2] sm:$0x3] }
 0xd6a   :  { %2177 = vmatmul.mubr.msk.f32.vlgmr.msra.gmra.mxu0 %vm86_vm2, %v1212_v19 }
 0xd6b   :  { %2191 = vmatpush3.msra.mxu0 %v2394_v1  ;;  %2198 = vmatprep.mubr.msk.f32.mxu0 %vm2346_vm1, %v2345_v0 }
 0xd6c   :  { %2192 = vmatprep.subr.mxu0 %v2345_v0 }
 0xd6d   :  { %v1317_v20 = vld [vmem:[#allocation3] sm:$0x3]  ;;  %2193 = vmatpush3.msra.mxu0 %v2400_v2 }
 0xd6e   :  { %2188 = vmatmul.mubr.msk.f32.vlgmr.msra.gmra.mxu1 %vm86_vm2, %v1317_v20  ;;  %2194 = vmatprep.subr.mxu0 %v2345_v0 }
 0xd6f   :  { %2195 = vmatpush3.msra.mxu0 %v2423_v5  ;;  %2202 = vmatpush3.msra.mxu1 %v2405_v3 }
 0xd70   :  { %2196 = vmatprep.subr.mxu0 %v2345_v0  ;;  %2203 = vmatprep.subr.mxu1 %v2345_v0 }
 0xd71   :  { %2197 = vmatpush3.msra.mxu0 %v2437_v7  ;;  %2204 = vmatpush3.msra.mxu1 %v2416_v4 }
 0xd72   :  { %2205 = vmatprep.subr.mxu1 %v2345_v0  ;;  %2209 = vmatprep.mubr.msk.f32.mxu1 %vm2346_vm1, %v2345_v0 }
 0xd73   :  { %2206 = vmatpush3.msra.mxu1 %v2430_v6  ;;  %2212 = vmatprep.subr.mxu0 %v2345_v0  ;;  %v1956_v6 = vld [vmem:[%s2882_s0 + $0xa] sm:$0x3] }
 0xd74   :  { %2207 = vmatprep.subr.mxu1 %v2345_v0 }
 0xd75   :  { %2208 = vmatpush3.msra.mxu1 %v2445_v8  ;;  %v1959_v8 = vld [vmem:[%s2883_s1 + $0x4] sm:$0x3] }
 0xd76   :  { %2223 = vmatprep.subr.mxu1 %v2345_v0 }
 0xe2a   :  { %v1282_v1 = vpop.f32.mrf.mxu0 }
 0xe2b   :  { %v1283_v2 = vadd.f32 %v2487_v11, %v1282_v1 }
 0xe2c   :  { %v2178_v3 = vpop.f32.mrf.mxu0 }
 0xe2d   :  { %1294 = vrot.lane.b32.xlu0 %v1283_v2, %s2347_s21  ;;  %v1286_v21 = vadd.f32 %v1956_v6, %v1283_v2 }
 0xe2e   :  { %v1387_v4 = vpop.f32.mrf.mxu1 }
 0xe2f   :  { %v1388_v5 = vadd.f32 %v2492_v13, %v1387_v4  ;;  %v1958_v22 = vmul.f32 -1.442695, %v1286_v21 }
 0xe30   :  { %v2189_v7 = vpop.f32.mrf.mxu1 }
 0xe31   :  { %1399 = vrot.lane.b32.xlu1 %v1388_v5, %s2347_s21  ;;  %v1391_v11 = vadd.f32 %v1959_v8, %v1388_v5  ;;  %2299 = vpow2.f32 %v1958_v22 }
 0xe33   :  { %v1961_v23 = vmul.f32 -1.442695, %v1391_v11 }
 0xe35   :  { %2301 = vpow2.f32 %v1961_v23 }
 0xe3e   :  { %v2300_v24 = vpop.eup %2299 }
 0xe3f   :  { %v1290_v25 = vadd.f32 1.0, %v2300_v24 }
 0xe41   :  { %2303 = vrcp.f32 %v1290_v25 }
 0xe42   :  { %v2302_v13 = vpop.eup %2301 }
 0xe43   :  { %v1395_v26 = vadd.f32 1.0, %v2302_v13 }
 0xe45   :  { %2305 = vrcp.f32 %v1395_v26 }
 0xe4e   :  { %v2304_v27 = vpop.eup %2303 }
 0xe4f   :  { %v1304_v40 = vsub.f32 1.0, %v2304_v27 }
 0xe52   :  { %v2306_v30 = vpop.eup %2305 }
 0xe53   :  { %v1409_v46 = vsub.f32 1.0, %v2306_v30 }
 0xe9f   :  { %v1295_v28 = vpop.permute.xlu0 %1294 }
 0xea0   :  { %v1297_v29 = vmul.f32 %v2304_v27, %v1295_v28 }
 0xea2   :  { %1299 = vrot.lane.b32.xlu0 %v1297_v29, %s2347_s21 }
 0xea3   :  { %v1400_v31 = vpop.permute.xlu1 %1399 }
 0xea4   :  { %v1402_v32 = vmul.f32 %v2306_v30, %v1400_v31 }
 0xea6   :  { %1404 = vrot.lane.b32.xlu1 %v1402_v32, %s2347_s21 }
 0xeaa   :  { %1310 = vrot.lane.b32.xlu1 %v1212_v19, %s2348_s26  ;;  %v1967_v19 = vld [vmem:[%s2883_s1 + $0x2] sm:$0x3] }
 0xeae   :  { %1415 = vrot.lane.b32.xlu1 %v1317_v20, %s2348_s26 }
 0xf14   :  { %v1300_v33 = vpop.permute.xlu0 %1299 }
 0xf15   :  { %v1302_v34 = vadd.f32 %v1956_v6, %v1300_v33 }
 0xf17   :  { %2307 = vtanh.f32 %v1302_v34 }
 0xf18   :  { %v1405_v35 = vpop.permute.xlu1 %1404 }
 0xf19   :  { %v1407_v36 = vadd.f32 %v1959_v8, %v1405_v35 }
 0xf1b   :  { %2309 = vtanh.f32 %v1407_v36 }
 0xf1c   :  { %v1311_v39 = vpop.permute.xlu1 %1310 }
 0xf1d   :  { %v1313_v42 = vmul.f32 %v2304_v27, %v1311_v39 }
 0xf20   :  { %v1416_v44 = vpop.permute.xlu1 %1415 }
 0xf21   :  { %v1418_v48 = vmul.f32 %v2306_v30, %v1416_v44 }
 0xf24   :  { %v2308_v37 = vpop.eup %2307 }
 0xf25   :  { %1306 = vrot.lane.b32.xlu0 %v2308_v37, %s2349_s27 }
 0xf28   :  { %v2310_v38 = vpop.eup %2309 }
 0xf29   :  { %1411 = vrot.lane.b32.xlu0 %v2310_v38, %s2349_s27 }
 0xf97   :  { %v1307_v41 = vpop.permute.xlu0 %1306 }
 0xf98   :  { %v1309_v43 = vmul.f32 %v1307_v41, %v1304_v40 }
 0xf9a   :  { %v1314_v45 = vadd.f32 %v1313_v42, %v1309_v43 }
 0xf9b   :  { %v1412_v47 = vpop.permute.xlu0 %1411 }
 0xf9c   :  { %v1414_v49 = vmul.f32 %v1412_v47, %v1409_v46  ;;  %1421 = vrot.lane.b32.xlu0 %v1314_v45, %s2349_s27 }
 0xf9e   :  { %v1419_v50 = vadd.f32 %v1418_v48, %v1414_v49 }
 0xfa0   :  { %1426 = vrot.lane.b32.xlu1 %v1419_v50, %s2349_s27 }
0x100e   :  { %v1422_v51 = vpop.permute.xlu0 %1421 }
0x100f   :  { %1424 = vst.msk [vmem:[#allocation2] sm:$0x3] %vm65_vm0, %v1422_v51  ;;  %1962 = vst.msk [vmem:[%s2884_s6 + $0xa] sm:$0x3] %vm65_vm0, %v1422_v51  ;;  %v1972_v51 = vld [vmem:[%s2882_s0 + $0xe] sm:$0x3] }
0x1012   :  { %v1427_v52 = vpop.permute.xlu1 %1426 }
0x1013   :  { %1429 = vst.msk [vmem:[#allocation3] sm:$0x3] %vm65_vm0, %v1427_v52  ;;  %1963 = vst.msk [vmem:[%s2885_s7 + $0x4] sm:$0x3] %vm65_vm0, %v1427_v52 }
0x1016   :  { %v1436_v53 = vld [vmem:[#allocation2] sm:$0x3] }
0x1017   :  { %2199 = vmatmul.mubr.msk.f32.vlgmr.msra.gmra.mxu0 %vm86_vm2, %v1436_v53 }
0x1018   :  { %2213 = vmatpush3.msra.mxu0 %v2335_v54  ;;  %2220 = vmatprep.mubr.msk.f32.mxu0 %vm2346_vm1, %v2345_v0 }
0x1019   :  { %2214 = vmatprep.subr.mxu0 %v2345_v0 }
0x101a   :  { %v1541_v55 = vld [vmem:[#allocation3] sm:$0x3]  ;;  %2215 = vmatpush3.msra.mxu0 %v2336_v56 }
0x101b   :  { %2210 = vmatmul.mubr.msk.f32.vlgmr.msra.gmra.mxu1 %vm86_vm2, %v1541_v55  ;;  %2216 = vmatprep.subr.mxu0 %v2345_v0 }
0x101c   :  { %2217 = vmatpush3.msra.mxu0 %v2337_v57  ;;  %2224 = vmatpush3.msra.mxu1 %v2338_v58 }
0x101d   :  { %2218 = vmatprep.subr.mxu0 %v2345_v0  ;;  %2225 = vmatprep.subr.mxu1 %v2345_v0 }
0x101e   :  { %2219 = vmatpush3.msra.mxu0 %v2339_v59  ;;  %2226 = vmatpush3.msra.mxu1 %v2340_v60 }
0x101f   :  { %2227 = vmatprep.subr.mxu1 %v2345_v0  ;;  %2231 = vmatprep.mubr.msk.f32.mxu1 %vm2346_vm1, %v2345_v0 }
0x1020   :  { %2228 = vmatpush3.msra.mxu1 %v2341_v61 }
0x1021   :  { %2229 = vmatprep.subr.mxu1 %v2345_v0  ;;  %v2820_v0 = vld [vmem:[%s2881_s5] ss:$0 sm:$0xff] }
0x1022   :  { %2230 = vmatpush3.msra.mxu1 %v2342_v62 }
0x10d7   :  { %v1506_v63 = vpop.f32.mrf.mxu0 }
0x10d8   :  { %v1507_v10 = vadd.f32 %v2813_v9, %v1506_v63 }
0x10d9   :  { %v2200_v12 = vpop.f32.mrf.mxu0 }
0x10da   :  { %1518 = vrot.lane.b32.xlu0 %v1507_v10, %s2347_s21  ;;  %v1510_v18 = vadd.f32 %v1964_v17, %v1507_v10 }
0x10db   :  { %v1611_v14 = vpop.f32.mrf.mxu1 }
0x10dc   :  { %v1612_v15 = vadd.f32 %v2820_v0, %v1611_v14  ;;  %v1966_v20 = vmul.f32 -1.442695, %v1510_v18 }
0x10dd   :  { %v2211_v16 = vpop.f32.mrf.mxu1 }
0x10de   :  { %1623 = vrot.lane.b32.xlu1 %v1612_v15, %s2347_s21  ;;  %v1615_v1 = vadd.f32 %v1967_v19, %v1612_v15  ;;  %2311 = vpow2.f32 %v1966_v20 }
0x10e0   :  { %v1969_v2 = vmul.f32 -1.442695, %v1615_v1 }
0x10e2   :  { %2313 = vpow2.f32 %v1969_v2 }
0x10eb   :  { %v2312_v3 = vpop.eup %2311 }
0x10ec   :  { %v1514_v4 = vadd.f32 1.0, %v2312_v3 }
0x10ee   :  { %2315 = vrcp.f32 %v1514_v4 }
0x10ef   :  { %v2314_v5 = vpop.eup %2313 }
0x10f0   :  { %v1619_v7 = vadd.f32 1.0, %v2314_v5 }
0x10f2   :  { %2317 = vrcp.f32 %v1619_v7 }
0x10fb   :  { %v2316_v6 = vpop.eup %2315 }
0x10fc   :  { %v1528_v30 = vsub.f32 1.0, %v2316_v6 }
0x10ff   :  { %v2318_v22 = vpop.eup %2317 }
0x1100   :  { %v1633_v36 = vsub.f32 1.0, %v2318_v22 }
0x114c   :  { %v1519_v21 = vpop.permute.xlu0 %1518 }
0x114d   :  { %v1521_v8 = vmul.f32 %v2316_v6, %v1519_v21 }
0x114f   :  { %1523 = vrot.lane.b32.xlu0 %v1521_v8, %s2347_s21 }
0x1150   :  { %v1624_v11 = vpop.permute.xlu1 %1623 }
0x1151   :  { %v1626_v23 = vmul.f32 %v2318_v22, %v1624_v11 }
0x1153   :  { %1628 = vrot.lane.b32.xlu1 %v1626_v23, %s2347_s21 }
0x1157   :  { %1534 = vrot.lane.b32.xlu1 %v1436_v53, %s2348_s26  ;;  %v1763_v53 = vld [vmem:[%s2883_s1] sm:$0x3] }
0x115b   :  { %1639 = vrot.lane.b32.xlu1 %v1541_v55, %s2348_s26 }
0x11c1   :  { %v1524_v24 = vpop.permute.xlu0 %1523 }
0x11c2   :  { %v1526_v25 = vadd.f32 %v1964_v17, %v1524_v24 }
0x11c4   :  { %2319 = vtanh.f32 %v1526_v25 }
0x11c5   :  { %v1629_v13 = vpop.permute.xlu1 %1628 }
0x11c6   :  { %v1631_v26 = vadd.f32 %v1967_v19, %v1629_v13 }
0x11c8   :  { %2321 = vtanh.f32 %v1631_v26 }
0x11c9   :  { %v1535_v29 = vpop.permute.xlu1 %1534 }
0x11ca   :  { %v1537_v32 = vmul.f32 %v2316_v6, %v1535_v29 }
0x11cd   :  { %v1640_v34 = vpop.permute.xlu1 %1639 }
0x11ce   :  { %v1642_v38 = vmul.f32 %v2318_v22, %v1640_v34 }
0x11d1   :  { %v2320_v27 = vpop.eup %2319 }
0x11d2   :  { %1530 = vrot.lane.b32.xlu0 %v2320_v27, %s2349_s27 }
0x11d5   :  { %v2322_v28 = vpop.eup %2321 }
0x11d6   :  { %1635 = vrot.lane.b32.xlu0 %v2322_v28, %s2349_s27 }
0x1244   :  { %v1531_v31 = vpop.permute.xlu0 %1530 }
0x1245   :  { %v1533_v33 = vmul.f32 %v1531_v31, %v1528_v30 }
0x1247   :  { %v1538_v35 = vadd.f32 %v1537_v32, %v1533_v33 }
0x1248   :  { %v1636_v37 = vpop.permute.xlu0 %1635 }
0x1249   :  { %v1638_v39 = vmul.f32 %v1636_v37, %v1633_v36  ;;  %1645 = vrot.lane.b32.xlu0 %v1538_v35, %s2349_s27 }
0x124b   :  { %v1643_v40 = vadd.f32 %v1642_v38, %v1638_v39 }
0x124d   :  { %1650 = vrot.lane.b32.xlu1 %v1643_v40, %s2349_s27 }
0x12bb   :  { %v1646_v41 = vpop.permute.xlu0 %1645 }
0x12bc   :  { %1648 = vst.msk [vmem:[#allocation2] sm:$0x3] %vm65_vm0, %v1646_v41  ;;  %1970 = vst.msk [vmem:[%s2884_s6 + $0xc] sm:$0x3] %vm65_vm0, %v1646_v41 }
0x12bf   :  { %v1651_v42 = vpop.permute.xlu1 %1650 }
0x12c0   :  { %1653 = vst.msk [vmem:[#allocation3] sm:$0x3] %vm65_vm0, %v1651_v42  ;;  %1971 = vst.msk [vmem:[%s2885_s7 + $0x2] sm:$0x3] %vm65_vm0, %v1651_v42 }
0x12c3   :  { %v1660_v43 = vld [vmem:[#allocation2] sm:$0x3] }
0x12c4   :  { %2221 = vmatmul.mubr.msk.f32.vlgmr.msra.gmra.mxu0 %vm86_vm2, %v1660_v43 }
0x12c7   :  { %v1764_v44 = vld [vmem:[#allocation3] sm:$0x3] }
0x12c8   :  { %2232 = vmatmul.mubr.msk.f32.vlgmr.msra.gmra.mxu1 %vm86_vm2, %v1764_v44 }
0x1384   :  { %v1730_v45 = vpop.f32.mrf.mxu0 }
0x1385   :  { %v1731_v46 = vadd.f32 %v2813_v9, %v1730_v45 }
0x1386   :  { %v2222_v47 = vpop.f32.mrf.mxu0 }
0x1387   :  { %1742 = vrot.lane.b32.xlu0 %v1731_v46, %s2347_s21  ;;  %v1734_v52 = vadd.f32 %v1972_v51, %v1731_v46 }
0x1388   :  { %v1834_v48 = vpop.f32.mrf.mxu1 }
0x1389   :  { %v1835_v49 = vadd.f32 %v2820_v0, %v1834_v48  ;;  %v1974_v54 = vmul.f32 -1.442695, %v1734_v52 }
0x138a   :  { %v2233_v50 = vpop.f32.mrf.mxu1 }
0x138b   :  { %1846 = vrot.lane.b32.xlu1 %v1835_v49, %s2347_s21  ;;  %v1838_v55 = vadd.f32 %v1835_v49, %v1763_v53  ;;  %2323 = vpow2.f32 %v1974_v54 }
0x138d   :  { %v1976_v56 = vmul.f32 -1.442695, %v1838_v55 }
0x138f   :  { %2325 = vpow2.f32 %v1976_v56 }
0x1398   :  { %v2324_v57 = vpop.eup %2323 }
0x1399   :  { %v1738_v58 = vadd.f32 1.0, %v2324_v57 }
0x139b   :  { %2327 = vrcp.f32 %v1738_v58 }
0x139c   :  { %v2326_v59 = vpop.eup %2325 }
0x139d   :  { %v1842_v60 = vadd.f32 1.0, %v2326_v59 }
0x139f   :  { %2329 = vrcp.f32 %v1842_v60 }
0x13a8   :  { %v2328_v61 = vpop.eup %2327 }
0x13a9   :  { %v1752_v20 = vsub.f32 1.0, %v2328_v61 }
0x13ac   :  { %v2330_v9 = vpop.eup %2329 }
0x13ad   :  { %v1856_v7 = vsub.f32 1.0, %v2330_v9 }
0x13f9   :  { %v1743_v62 = vpop.permute.xlu0 %1742 }
0x13fa   :  { %v1745_v63 = vmul.f32 %v2328_v61, %v1743_v62 }
0x13fc   :  { %1747 = vrot.lane.b32.xlu0 %v1745_v63, %s2347_s21 }
0x13fd   :  { %v1847_v10 = vpop.permute.xlu1 %1846 }
0x13fe   :  { %v1849_v12 = vmul.f32 %v2330_v9, %v1847_v10 }
0x1400   :  { %1851 = vrot.lane.b32.xlu1 %v1849_v12, %s2347_s21 }
0x1404   :  { %1758 = vrot.lane.b32.xlu1 %v1660_v43, %s2348_s26 }
0x1408   :  { %1862 = vrot.lane.b32.xlu1 %v1764_v44, %s2348_s26 }
0x146e   :  { %v1748_v14 = vpop.permute.xlu0 %1747 }
0x146f   :  { %v1750_v0 = vadd.f32 %v1972_v51, %v1748_v14 }
0x1471   :  { %2331 = vtanh.f32 %v1750_v0 }
0x1472   :  { %v1852_v15 = vpop.permute.xlu1 %1851 }
0x1473   :  { %v1854_v16 = vadd.f32 %v1852_v15, %v1763_v53 }
0x1475   :  { %2333 = vtanh.f32 %v1854_v16 }
0x1476   :  { %v1759_v19 = vpop.permute.xlu1 %1758 }
0x1477   :  { %v1761_v2 = vmul.f32 %v2328_v61, %v1759_v19 }
0x147a   :  { %v1863_v4 = vpop.permute.xlu1 %1862 }
0x147b   :  { %v1865_v21 = vmul.f32 %v2330_v9, %v1863_v4 }
0x147e   :  { %v2332_v17 = vpop.eup %2331 }
0x147f   :  { %1754 = vrot.lane.b32.xlu0 %v2332_v17, %s2349_s27 }
0x1482   :  { %v2334_v18 = vpop.eup %2333 }
0x1483   :  { %1858 = vrot.lane.b32.xlu0 %v2334_v18, %s2349_s27 }
0x14f1   :  { %v1755_v1 = vpop.permute.xlu0 %1754 }
0x14f2   :  { %v1757_v3 = vmul.f32 %v1755_v1, %v1752_v20 }
0x14f4   :  { %v1762_v5 = vadd.f32 %v1761_v2, %v1757_v3 }
0x14f5   :  { %v1859_v6 = vpop.permute.xlu0 %1858 }
0x14f6   :  { %v1861_v8 = vmul.f32 %v1859_v6, %v1856_v7  ;;  %1868 = vrot.lane.b32.xlu0 %v1762_v5, %s2349_s27 }
0x14f8   :  { %v1866_v22 = vadd.f32 %v1865_v21, %v1861_v8 }
0x14fa   :  { %1873 = vrot.lane.b32.xlu1 %v1866_v22, %s2349_s27 }
0x1568   :  { %v1869_v11 = vpop.permute.xlu0 %1868 }
0x1569   :  { %1871 = vst.msk [vmem:[#allocation2] sm:$0x3] %vm65_vm0, %v1869_v11  ;;  %1977 = vst.msk [vmem:[%s2884_s6 + $0xe] sm:$0x3] %vm65_vm0, %v1869_v11 }
0x156c   :  { %v1874_v23 = vpop.permute.xlu1 %1873 }
0x156d   :  { %1876 = vst.msk [vmem:[#allocation3] sm:$0x3] %vm65_vm0, %v1874_v23  ;;  %1879 = vst.msk [vmem:[%s2885_s7] sm:$0x3] %vm65_vm0, %v1874_v23 }

</bundles_post_ra>
